<compile_context>
chip_gen: v7x
topology: tpu7x:2x2x1
jax: 0.10.0
libtpu: 0.0.40
codegen_flags: <defaults>
</compile_context>

<pallas_src>
import functools

import jax
import jax.numpy as jnp
import numpy as np
from jax import lax
from jax.experimental import pallas as pl
from jax.experimental.pallas import tpu as pltpu


def _round_up(x, m):
    return (x + m - 1) // m * m


def _pagru_rnn_kernel(x_ref, w_i_ref, w_h_ref, b_i_ref, b_hn_ref,
                      alpha_ref, w_fc_ref, b_fc_ref,
                      out_ref,
                      gi_s, h_s,
                      *, b_tile, t_chunk, hp, unroll):
    """One grid step == one (batch tile, time chunk).

    x_ref:    (1, Tc*Bt, I)   t-major (then batch-within-tile) input slab for this chunk
    w_i_ref:  (I, 3*Hp)       stacked [r|z|n] input->hidden weights (pre-transposed, padded)
    w_h_ref:  (Hp, 3*Hp)      stacked hidden->hidden weights
    b_i_ref:  (1, 3*Hp)       [b_ir+b_hr | b_iz+b_hz | b_in]
    b_hn_ref: (1, Hp)         b_hn (kept separate: r * (W_hn h + b_hn))
    alpha:    (1, Hp)         alpha logits
    w_fc:     (Hp, Op), b_fc: (1, Op)
    out_ref:  (Bt, Op)        sigmoid(fc(h_T)) for this batch tile (written at last chunk)
    gi_s:     (Tc*Bt, 3*Hp) f32 scratch: fused input projections for this chunk
    h_s:      (Bt, Hp) f32 scratch: hidden state carried across the time-chunk axis
    """
    Bt = b_tile
    c = pl.program_id(1)

    @pl.when(c == 0)
    def _():
        h_s[...] = jnp.zeros_like(h_s)

    # ---- One fused MXU pass for the whole chunk's input projections -------------
    gi_s[...] = jnp.dot(x_ref[0], w_i_ref[...],
                        preferred_element_type=jnp.float32) + b_i_ref[...]

    w_h = w_h_ref[...]
    b_hn = b_hn_ref[...]
    a_sig = jax.nn.sigmoid(alpha_ref[...].astype(jnp.float32))   # hoisted, once
    mxu_dtype = w_h.dtype

    # ---- Serial recurrence over the chunk's timesteps ---------------------------
    def step(t, h):
        off = pl.multiple_of(t * Bt, Bt)
        # ONE fused (Bt, Hp) @ (Hp, 3*Hp) dot per step; gate slices are 128-aligned.
        gh = jnp.dot(h.astype(mxu_dtype), w_h, preferred_element_type=jnp.float32)
        gi = gi_s[pl.ds(off, Bt), :]                         # (Bt, 3*Hp), contiguous
        r = jax.nn.sigmoid(gi[:, :hp] + gh[:, :hp])
        z = jax.nn.sigmoid(gi[:, hp:2 * hp] + gh[:, hp:2 * hp])
        n = jnp.tanh(gi[:, 2 * hp:] + r * (gh[:, 2 * hp:] + b_hn))
        z_eff = a_sig * z
        return (1.0 - z_eff) * n + z_eff * h

    h_s[...] = lax.fori_loop(0, t_chunk, step, h_s[...], unroll=unroll)

    # ---- Final fc + sigmoid only after the last time chunk ----------------------
    @pl.when(c == pl.num_programs(1) - 1)
    def _():
        logits = jnp.dot(h_s[...].astype(mxu_dtype), w_fc_ref[...],
                         preferred_element_type=jnp.float32) + b_fc_ref[...]
        out_ref[...] = jax.nn.sigmoid(logits).astype(out_ref.dtype)


def simple_rnn_forward(x, params, *, matmul_dtype=jnp.float32):
    """x: [B, T, I] float32. Returns sigmoid(fc(h_T)): [B, O] float32."""
    B, T, I = x.shape
    H = params["w_hh"].shape[0] // 3
    O = params["w_fc"].shape[0]
    Hp = _round_up(H, 128)        # lane-padded hidden size (per gate block)
    Op = _round_up(O, 128)        # lane-padded output size

    # ---- Batch tiling: f32 sublane aligned; >=2 tiles when possible (v7x 2 TCs) ----
    if B > 128:
        B_tile = 128
    elif B >= 16:
        B_tile = _round_up(pl.cdiv(B, 2), 8)
    else:
        B_tile = _round_up(B, 8)
    B_pad = _round_up(B, B_tile)
    n_bt = B_pad // B_tile

    # ---- Time chunking from the device VMEM budget ----------------------------------
    mm_bytes = jnp.dtype(matmul_dtype).itemsize
    phys_vmem = 64 * 1024 * 1024
    try:
        phys_vmem = int(pltpu.get_tpu_info().vmem_capacity_bytes)
    except Exception:
        pass
    # chunk-independent VMEM: (double-buffered) weights/biases + h carry + out block
    fixed = (2 * (I * 3 * Hp + Hp * 3 * Hp + Hp * Op) * mm_bytes
             + 2 * (3 * Hp + Hp + Hp + Op) * 4
             + B_tile * Hp * 4 + 2 * B_tile * Op * 4)
    per_step = B_tile * (3 * Hp * 4 + 2 * I * mm_bytes)   # gi scratch + 2x-buffered x
    budget = int(phys_vmem * 0.45) - fixed
    max_tc = max(1, budget // max(per_step, 1))
    T_chunk = 1
    for d in range(1, T + 1):                              # largest divisor of T <= max_tc
        if T % d == 0 and d <= max_tc:
            T_chunk = d
    n_tc = T // T_chunk

    est = fixed + T_chunk * per_step + (1 << 20)
    vmem_limit = int(min(max(2 * est, 32 * 1024 * 1024), int(phys_vmem * 0.9)))

    # Bounded unroll keeps vreg pressure sane for large tiles.
    unroll = 8 if B_tile * Hp <= 64 * 128 else 4
    unroll = max(1, min(unroll, T_chunk))

    # ---- Input slab: t-major within each batch tile (padded batch) ------------------
    x_p = jnp.pad(x, ((0, B_pad - B), (0, 0), (0, 0)))
    x_g = x_p.reshape(n_bt, B_tile, T, I).transpose(0, 2, 1, 3).reshape(
        n_bt, T * B_tile, I).astype(matmul_dtype)

    # ---- Stacked, gate-block-padded weights / biases ---------------------------------
    w_ih, w_hh = params["w_ih"], params["w_hh"]     # (3H, I), (3H, H)
    b_ih, b_hh = params["b_ih"], params["b_hh"]     # (3H,), (3H,)

    def pad_cols(w_t):                               # (K, H) -> (K, Hp)
        return jnp.pad(w_t, ((0, 0), (0, Hp - H)))

    def pad_vec(v):                                  # (H,) -> (1, Hp)
        return jnp.pad(v, (0, Hp - H)).reshape(1, Hp)

    w_i = jnp.concatenate([pad_cols(w_ih[g * H:(g + 1) * H].T) for g in range(3)],
                          axis=1).astype(matmul_dtype)                       # (I, 3Hp)
    w_h = jnp.pad(
        jnp.concatenate([pad_cols(w_hh[g * H:(g + 1) * H].T) for g in range(3)], axis=1),
        ((0, Hp - H), (0, 0))).astype(matmul_dtype)                          # (Hp, 3Hp)
    b_i = jnp.concatenate([pad_vec(b_ih[0:H] + b_hh[0:H]),
                           pad_vec(b_ih[H:2 * H] + b_hh[H:2 * H]),
                           pad_vec(b_ih[2 * H:])], axis=1).astype(jnp.float32)  # (1, 3Hp)
    b_hn = pad_vec(b_hh[2 * H:]).astype(jnp.float32)
    alpha = pad_vec(params["alpha"]).astype(jnp.float32)
    w_fc = jnp.pad(params["w_fc"].T, ((0, Hp - H), (0, Op - O))).astype(matmul_dtype)
    b_fc = jnp.pad(params["b_fc"], (0, Op - O)).reshape(1, Op).astype(jnp.float32)

    kernel = functools.partial(_pagru_rnn_kernel, b_tile=B_tile, t_chunk=T_chunk,
                               hp=Hp, unroll=unroll)
    const2 = lambda b, c: (0, 0)

    out_pad = pl.pallas_call(
        kernel,
        out_shape=jax.ShapeDtypeStruct((B_pad, Op), jnp.float32),
        grid=(n_bt, n_tc),
        in_specs=[
            pl.BlockSpec((1, T_chunk * B_tile, I), lambda b, c: (b, c, 0)),  # x chunk
            pl.BlockSpec((I, 3 * Hp), const2),                               # W_i stacked
            pl.BlockSpec((Hp, 3 * Hp), const2),                              # W_h stacked
            pl.BlockSpec((1, 3 * Hp), const2),                               # b_i stacked
            pl.BlockSpec((1, Hp), const2),                                   # b_hn
            pl.BlockSpec((1, Hp), const2),                                   # alpha
            pl.BlockSpec((Hp, Op), const2),                                  # W_fc^T
            pl.BlockSpec((1, Op), const2),                                   # b_fc
        ],
        out_specs=pl.BlockSpec((B_tile, Op), lambda b, c: (b, 0)),
        scratch_shapes=[
            pltpu.VMEM((T_chunk * B_tile, 3 * Hp), jnp.float32),  # fused gi projections
            pltpu.VMEM((B_tile, Hp), jnp.float32),                # hidden-state carry
        ],
        compiler_params=pltpu.CompilerParams(
            dimension_semantics=("parallel", "arbitrary"),
            vmem_limit_bytes=vmem_limit,
        ),
    )(x_g, w_i, w_h, b_i, b_hn, alpha, w_fc, b_fc)

    return out_pad[:B, :O]


def reference_forward(x, params):
    """Pure-JAX reference reproducing the assumed PaGRU + fc + sigmoid semantics."""
    B, T, I = x.shape
    H = params["w_hh"].shape[0] // 3
    h = jnp.zeros((B, H), jnp.float32)
    alpha = jax.nn.sigmoid(params["alpha"].reshape(1, H))
    for t in range(T):
        x_t = x[:, t, :]
        gi = x_t @ params["w_ih"].T + params["b_ih"]
        gh = h @ params["w_hh"].T + params["b_hh"]
        i_r, i_z, i_n = gi[:, :H], gi[:, H:2 * H], gi[:, 2 * H:]
        h_r, h_z, h_n = gh[:, :H], gh[:, H:2 * H], gh[:, 2 * H:]
        r = jax.nn.sigmoid(i_r + h_r)
        z = jax.nn.sigmoid(i_z + h_z)
        n = jnp.tanh(i_n + r * h_n)
        z_eff = alpha * z
        h = (1.0 - z_eff) * n + z_eff * h
    return jax.nn.sigmoid(h @ params["w_fc"].T + params["b_fc"])


def init_params(key, input_size, hidden_size, output_size):
    ks = jax.random.split(key, 7)
    s_ih = 1.0 / np.sqrt(hidden_size)
    s_fc = 1.0 / np.sqrt(hidden_size)
    return {
        "w_ih": jax.random.uniform(ks[0], (3 * hidden_size, input_size), jnp.float32, -s_ih, s_ih),
        "w_hh": jax.random.uniform(ks[1], (3 * hidden_size, hidden_size), jnp.float32, -s_ih, s_ih),
        "b_ih": jax.random.uniform(ks[2], (3 * hidden_size,), jnp.float32, -s_ih, s_ih),
        "b_hh": jax.random.uniform(ks[3], (3 * hidden_size,), jnp.float32, -s_ih, s_ih),
        "alpha": jax.random.normal(ks[4], (hidden_size,), jnp.float32) * 0.1,
        "w_fc": jax.random.uniform(ks[5], (output_size, hidden_size), jnp.float32, -s_fc, s_fc),
        "b_fc": jax.random.uniform(ks[6], (output_size,), jnp.float32, -s_fc, s_fc),
    }


if __name__ == "__main__":
    B, T, I, H, O = 2, 8, 16, 32, 2   # batch, seq, input_size, hidden_size, output_size

    key = jax.random.PRNGKey(0)
    k_x, k_p = jax.random.split(key)
    x = jax.random.normal(k_x, (B, T, I), jnp.float32)
    params = init_params(k_p, I, H, O)

    ref = reference_forward(x, params)

    # f32 MXU operands: exact check against the pure-JAX reference.
    out_f32 = jax.block_until_ready(simple_rnn_forward(x, params))
    np.testing.assert_allclose(np.asarray(out_f32), np.asarray(ref), rtol=1e-5, atol=1e-5)

    # bf16 MXU operands (v5e/v6e/v7x fast path), f32 accumulation + f32 gate math.
    out_bf16 = jax.block_until_ready(
        simple_rnn_forward(x, params, matmul_dtype=jnp.bfloat16))
    np.testing.assert_allclose(np.asarray(out_bf16), np.asarray(ref), rtol=5e-2, atol=5e-2)

    print("KERNEL_OK")
</pallas_src>

<mosaic_0001>
module attributes {stable_mosaic.version = 11 : i64} {
  func.func @_pagru_rnn_kernel(%arg0: i32, %arg1: i32, %arg2: memref<1x64x16xf32, #tpu.memory_space<vmem>>, %arg3: memref<16x384xf32, #tpu.memory_space<vmem>>, %arg4: memref<128x384xf32, #tpu.memory_space<vmem>>, %arg5: memref<1x384xf32, #tpu.memory_space<vmem>>, %arg6: memref<1x128xf32, #tpu.memory_space<vmem>>, %arg7: memref<1x128xf32, #tpu.memory_space<vmem>>, %arg8: memref<128x128xf32, #tpu.memory_space<vmem>>, %arg9: memref<1x128xf32, #tpu.memory_space<vmem>>, %arg10: memref<8x128xf32, #tpu.memory_space<vmem>>, %arg11: memref<64x384xf32, #tpu.memory_space<vmem>>, %arg12: memref<8x128xf32, #tpu.memory_space<vmem>>) attributes {dimension_semantics = [#tpu.dimension_semantics<parallel>, #tpu.dimension_semantics<arbitrary>], iteration_bounds = array<i64: 1, 1>, scalar_prefetch = 0 : i64, scratch_operands = 2 : i64, tpu.core_type = #tpu.core_type<tc>, window_params = [{transform_indices = @transform_0, window_bounds = array<i64: 1, 64, 16>}, {pipeline_mode = #tpu.pipeline_mode<synchronous>, transform_indices = @transform_1, window_bounds = array<i64: 16, 384>}, {pipeline_mode = #tpu.pipeline_mode<synchronous>, transform_indices = @transform_2, window_bounds = array<i64: 128, 384>}, {pipeline_mode = #tpu.pipeline_mode<synchronous>, transform_indices = @transform_3, window_bounds = array<i64: 1, 384>}, {pipeline_mode = #tpu.pipeline_mode<synchronous>, transform_indices = @transform_4, window_bounds = array<i64: 1, 128>}, {pipeline_mode = #tpu.pipeline_mode<synchronous>, transform_indices = @transform_5, window_bounds = array<i64: 1, 128>}, {pipeline_mode = #tpu.pipeline_mode<synchronous>, transform_indices = @transform_6, window_bounds = array<i64: 128, 128>}, {pipeline_mode = #tpu.pipeline_mode<synchronous>, transform_indices = @transform_7, window_bounds = array<i64: 1, 128>}, {transform_indices = @transform_8, window_bounds = array<i64: 8, 128>}]} {
    %c0_i32 = arith.constant 0 : i32
    %0 = arith.cmpi eq, %arg1, %c0_i32 : i32
    %1 = arith.extui %0 : i1 to i32
    %c0_i32_0 = arith.constant 0 : i32
    %2 = arith.cmpi ne, %1, %c0_i32_0 : i32
    scf.if %2 {
      %cst_71 = arith.constant 0.000000e+00 : f32
      %304 = vector.broadcast %cst_71 : f32 to vector<8x128xf32>
      %c0_72 = arith.constant 0 : index
      %c0_73 = arith.constant 0 : index
      %305 = vector.load %arg12[%c0_72, %c0_73] : memref<8x128xf32, #tpu.memory_space<vmem>>, vector<8x128xf32>
      tpu.vector_store %arg12[%c0_72, %c0_73], %304 {strides = array<i32>} : memref<8x128xf32, #tpu.memory_space<vmem>>, vector<8x128xf32>,
    } else {
    }
    %c0 = arith.constant 0 : index
    %c0_1 = arith.constant 0 : index
    %c0_2 = arith.constant 0 : index
    %3 = vector.load %arg2[%c0, %c0_1, %c0_2] : memref<1x64x16xf32, #tpu.memory_space<vmem>>, vector<1x64x16xf32>
    %4 = vector.shape_cast %3 : vector<1x64x16xf32> to vector<64x16xf32>
    %c0_3 = arith.constant 0 : index
    %c0_4 = arith.constant 0 : index
    %5 = vector.load %arg3[%c0_3, %c0_4] : memref<16x384xf32, #tpu.memory_space<vmem>>, vector<16x384xf32>
    %cst = arith.constant dense<0.000000e+00> : vector<64x384xf32>
    %6 = tpu.matmul %4, %5, %cst {dimension_numbers = #tpu.dot_dimension_numbers<[1], [0], [0], [1], [0, 0, 1, 1], [], []>} : vector<64x16xf32>, vector<16x384xf32>, vector<64x384xf32> -> vector<64x384xf32>
    %c0_5 = arith.constant 0 : index
    %c0_6 = arith.constant 0 : index
    %7 = vector.load %arg5[%c0_5, %c0_6] : memref<1x384xf32, #tpu.memory_space<vmem>>, vector<1x384xf32>
    %8 = vector.broadcast %7 : vector<1x384xf32> to vector<64x384xf32>
    %9 = arith.addf %6, %8 : vector<64x384xf32>
    %c0_7 = arith.constant 0 : index
    %c0_8 = arith.constant 0 : index
    %10 = vector.load %arg11[%c0_7, %c0_8] : memref<64x384xf32, #tpu.memory_space<vmem>>, vector<64x384xf32>
    tpu.vector_store %arg11[%c0_7, %c0_8], %9 {strides = array<i32>} : memref<64x384xf32, #tpu.memory_space<vmem>>, vector<64x384xf32>,
    %c0_9 = arith.constant 0 : index
    %c0_10 = arith.constant 0 : index
    %11 = vector.load %arg4[%c0_9, %c0_10] : memref<128x384xf32, #tpu.memory_space<vmem>>, vector<128x384xf32>
    %c0_11 = arith.constant 0 : index
    %c0_12 = arith.constant 0 : index
    %12 = vector.load %arg6[%c0_11, %c0_12] : memref<1x128xf32, #tpu.memory_space<vmem>>, vector<1x128xf32>
    %c0_13 = arith.constant 0 : index
    %c0_14 = arith.constant 0 : index
    %13 = vector.load %arg7[%c0_13, %c0_14] : memref<1x128xf32, #tpu.memory_space<vmem>>, vector<1x128xf32>
    %14 = arith.negf %13 : vector<1x128xf32>
    %15 = math.exp %14 : vector<1x128xf32>
    %cst_15 = arith.constant 1.000000e+00 : f32
    %16 = vector.broadcast %cst_15 : f32 to vector<1x128xf32>
    %17 = arith.addf %16, %15 : vector<1x128xf32>
    %18 = arith.divf %16, %17 : vector<1x128xf32>
    %c0_16 = arith.constant 0 : index
    %c0_17 = arith.constant 0 : index
    %19 = vector.load %arg12[%c0_16, %c0_17] : memref<8x128xf32, #tpu.memory_space<vmem>>, vector<8x128xf32>
    %c0_i32_18 = arith.constant 0 : i32
    %c8_i32 = arith.constant 8 : i32
    %20 = arith.muli %c0_i32_18, %c8_i32 : i32
    %21 = tpu.assume_multiple %20, 8 : i32
    %cst_19 = arith.constant dense<0.000000e+00> : vector<8x384xf32>
    %22 = tpu.matmul %19, %11, %cst_19 {dimension_numbers = #tpu.dot_dimension_numbers<[1], [0], [0], [1], [0, 0, 1, 1], [], []>} : vector<8x128xf32>, vector<128x384xf32>, vector<8x384xf32> -> vector<8x384xf32>
    %23 = arith.index_cast %21 : i32 to index
    %c0_20 = arith.constant 0 : index
    %24 = vector.load %arg11[%23, %c0_20] : memref<64x384xf32, #tpu.memory_space<vmem>>, vector<8x384xf32>
    %25 = vector.extract_strided_slice %24 {offsets = [0, 0], sizes = [8, 128], strides = [1, 1]} : vector<8x384xf32> to vector<8x128xf32>
    %26 = vector.extract_strided_slice %22 {offsets = [0, 0], sizes = [8, 128], strides = [1, 1]} : vector<8x384xf32> to vector<8x128xf32>
    %27 = arith.addf %25, %26 : vector<8x128xf32>
    %28 = arith.negf %27 : vector<8x128xf32>
    %29 = math.exp %28 : vector<8x128xf32>
    %cst_21 = arith.constant 1.000000e+00 : f32
    %30 = vector.broadcast %cst_21 : f32 to vector<8x128xf32>
    %31 = arith.addf %30, %29 : vector<8x128xf32>
    %32 = arith.divf %30, %31 : vector<8x128xf32>
    %33 = vector.extract_strided_slice %24 {offsets = [0, 128], sizes = [8, 128], strides = [1, 1]} : vector<8x384xf32> to vector<8x128xf32>
    %34 = vector.extract_strided_slice %22 {offsets = [0, 128], sizes = [8, 128], strides = [1, 1]} : vector<8x384xf32> to vector<8x128xf32>
    %35 = arith.addf %33, %34 : vector<8x128xf32>
    %36 = arith.negf %35 : vector<8x128xf32>
    %37 = math.exp %36 : vector<8x128xf32>
    %cst_22 = arith.constant 1.000000e+00 : f32
    %38 = vector.broadcast %cst_22 : f32 to vector<8x128xf32>
    %39 = arith.addf %38, %37 : vector<8x128xf32>
    %40 = arith.divf %38, %39 : vector<8x128xf32>
    %41 = vector.extract_strided_slice %24 {offsets = [0, 256], sizes = [8, 128], strides = [1, 1]} : vector<8x384xf32> to vector<8x128xf32>
    %42 = vector.extract_strided_slice %22 {offsets = [0, 256], sizes = [8, 128], strides = [1, 1]} : vector<8x384xf32> to vector<8x128xf32>
    %43 = vector.broadcast %12 : vector<1x128xf32> to vector<8x128xf32>
    %44 = arith.addf %42, %43 : vector<8x128xf32>
    %45 = arith.mulf %32, %44 : vector<8x128xf32>
    %46 = arith.addf %41, %45 : vector<8x128xf32>
    %47 = math.tanh %46 : vector<8x128xf32>
    %48 = vector.broadcast %18 : vector<1x128xf32> to vector<8x128xf32>
    %49 = arith.mulf %48, %40 : vector<8x128xf32>
    %cst_23 = arith.constant 1.000000e+00 : f32
    %50 = vector.broadcast %cst_23 : f32 to vector<8x128xf32>
    %51 = arith.subf %50, %49 : vector<8x128xf32>
    %52 = arith.mulf %51, %47 : vector<8x128xf32>
    %53 = arith.mulf %49, %19 : vector<8x128xf32>
    %54 = arith.addf %52, %53 : vector<8x128xf32>
    %c1_i32 = arith.constant 1 : i32
    %c8_i32_24 = arith.constant 8 : i32
    %55 = arith.muli %c1_i32, %c8_i32_24 : i32
    %56 = tpu.assume_multiple %55, 8 : i32
    %cst_25 = arith.constant dense<0.000000e+00> : vector<8x384xf32>
    %57 = tpu.matmul %54, %11, %cst_25 {dimension_numbers = #tpu.dot_dimension_numbers<[1], [0], [0], [1], [0, 0, 1, 1], [], []>} : vector<8x128xf32>, vector<128x384xf32>, vector<8x384xf32> -> vector<8x384xf32>
    %58 = arith.index_cast %56 : i32 to index
    %c0_26 = arith.constant 0 : index
    %59 = vector.load %arg11[%58, %c0_26] : memref<64x384xf32, #tpu.memory_space<vmem>>, vector<8x384xf32>
    %60 = vector.extract_strided_slice %59 {offsets = [0, 0], sizes = [8, 128], strides = [1, 1]} : vector<8x384xf32> to vector<8x128xf32>
    %61 = vector.extract_strided_slice %57 {offsets = [0, 0], sizes = [8, 128], strides = [1, 1]} : vector<8x384xf32> to vector<8x128xf32>
    %62 = arith.addf %60, %61 : vector<8x128xf32>
    %63 = arith.negf %62 : vector<8x128xf32>
    %64 = math.exp %63 : vector<8x128xf32>
    %cst_27 = arith.constant 1.000000e+00 : f32
    %65 = vector.broadcast %cst_27 : f32 to vector<8x128xf32>
    %66 = arith.addf %65, %64 : vector<8x128xf32>
    %67 = arith.divf %65, %66 : vector<8x128xf32>
    %68 = vector.extract_strided_slice %59 {offsets = [0, 128], sizes = [8, 128], strides = [1, 1]} : vector<8x384xf32> to vector<8x128xf32>
    %69 = vector.extract_strided_slice %57 {offsets = [0, 128], sizes = [8, 128], strides = [1, 1]} : vector<8x384xf32> to vector<8x128xf32>
    %70 = arith.addf %68, %69 : vector<8x128xf32>
    %71 = arith.negf %70 : vector<8x128xf32>
    %72 = math.exp %71 : vector<8x128xf32>
    %cst_28 = arith.constant 1.000000e+00 : f32
    %73 = vector.broadcast %cst_28 : f32 to vector<8x128xf32>
    %74 = arith.addf %73, %72 : vector<8x128xf32>
    %75 = arith.divf %73, %74 : vector<8x128xf32>
    %76 = vector.extract_strided_slice %59 {offsets = [0, 256], sizes = [8, 128], strides = [1, 1]} : vector<8x384xf32> to vector<8x128xf32>
    %77 = vector.extract_strided_slice %57 {offsets = [0, 256], sizes = [8, 128], strides = [1, 1]} : vector<8x384xf32> to vector<8x128xf32>
    %78 = vector.broadcast %12 : vector<1x128xf32> to vector<8x128xf32>
    %79 = arith.addf %77, %78 : vector<8x128xf32>
    %80 = arith.mulf %67, %79 : vector<8x128xf32>
    %81 = arith.addf %76, %80 : vector<8x128xf32>
    %82 = math.tanh %81 : vector<8x128xf32>
    %83 = vector.broadcast %18 : vector<1x128xf32> to vector<8x128xf32>
    %84 = arith.mulf %83, %75 : vector<8x128xf32>
    %cst_29 = arith.constant 1.000000e+00 : f32
    %85 = vector.broadcast %cst_29 : f32 to vector<8x128xf32>
    %86 = arith.subf %85, %84 : vector<8x128xf32>
    %87 = arith.mulf %86, %82 : vector<8x128xf32>
    %88 = arith.mulf %84, %54 : vector<8x128xf32>
    %89 = arith.addf %87, %88 : vector<8x128xf32>
    %c2_i32 = arith.constant 2 : i32
    %c8_i32_30 = arith.constant 8 : i32
    %90 = arith.muli %c2_i32, %c8_i32_30 : i32
    %91 = tpu.assume_multiple %90, 8 : i32
    %cst_31 = arith.constant dense<0.000000e+00> : vector<8x384xf32>
    %92 = tpu.matmul %89, %11, %cst_31 {dimension_numbers = #tpu.dot_dimension_numbers<[1], [0], [0], [1], [0, 0, 1, 1], [], []>} : vector<8x128xf32>, vector<128x384xf32>, vector<8x384xf32> -> vector<8x384xf32>
    %93 = arith.index_cast %91 : i32 to index
    %c0_32 = arith.constant 0 : index
    %94 = vector.load %arg11[%93, %c0_32] : memref<64x384xf32, #tpu.memory_space<vmem>>, vector<8x384xf32>
    %95 = vector.extract_strided_slice %94 {offsets = [0, 0], sizes = [8, 128], strides = [1, 1]} : vector<8x384xf32> to vector<8x128xf32>
    %96 = vector.extract_strided_slice %92 {offsets = [0, 0], sizes = [8, 128], strides = [1, 1]} : vector<8x384xf32> to vector<8x128xf32>
    %97 = arith.addf %95, %96 : vector<8x128xf32>
    %98 = arith.negf %97 : vector<8x128xf32>
    %99 = math.exp %98 : vector<8x128xf32>
    %cst_33 = arith.constant 1.000000e+00 : f32
    %100 = vector.broadcast %cst_33 : f32 to vector<8x128xf32>
    %101 = arith.addf %100, %99 : vector<8x128xf32>
    %102 = arith.divf %100, %101 : vector<8x128xf32>
    %103 = vector.extract_strided_slice %94 {offsets = [0, 128], sizes = [8, 128], strides = [1, 1]} : vector<8x384xf32> to vector<8x128xf32>
    %104 = vector.extract_strided_slice %92 {offsets = [0, 128], sizes = [8, 128], strides = [1, 1]} : vector<8x384xf32> to vector<8x128xf32>
    %105 = arith.addf %103, %104 : vector<8x128xf32>
    %106 = arith.negf %105 : vector<8x128xf32>
    %107 = math.exp %106 : vector<8x128xf32>
    %cst_34 = arith.constant 1.000000e+00 : f32
    %108 = vector.broadcast %cst_34 : f32 to vector<8x128xf32>
    %109 = arith.addf %108, %107 : vector<8x128xf32>
    %110 = arith.divf %108, %109 : vector<8x128xf32>
    %111 = vector.extract_strided_slice %94 {offsets = [0, 256], sizes = [8, 128], strides = [1, 1]} : vector<8x384xf32> to vector<8x128xf32>
    %112 = vector.extract_strided_slice %92 {offsets = [0, 256], sizes = [8, 128], strides = [1, 1]} : vector<8x384xf32> to vector<8x128xf32>
    %113 = vector.broadcast %12 : vector<1x128xf32> to vector<8x128xf32>
    %114 = arith.addf %112, %113 : vector<8x128xf32>
    %115 = arith.mulf %102, %114 : vector<8x128xf32>
    %116 = arith.addf %111, %115 : vector<8x128xf32>
    %117 = math.tanh %116 : vector<8x128xf32>
    %118 = vector.broadcast %18 : vector<1x128xf32> to vector<8x128xf32>
    %119 = arith.mulf %118, %110 : vector<8x128xf32>
    %cst_35 = arith.constant 1.000000e+00 : f32
    %120 = vector.broadcast %cst_35 : f32 to vector<8x128xf32>
    %121 = arith.subf %120, %119 : vector<8x128xf32>
    %122 = arith.mulf %121, %117 : vector<8x128xf32>
    %123 = arith.mulf %119, %89 : vector<8x128xf32>
    %124 = arith.addf %122, %123 : vector<8x128xf32>
    %c3_i32 = arith.constant 3 : i32
    %c8_i32_36 = arith.constant 8 : i32
    %125 = arith.muli %c3_i32, %c8_i32_36 : i32
    %126 = tpu.assume_multiple %125, 8 : i32
    %cst_37 = arith.constant dense<0.000000e+00> : vector<8x384xf32>
    %127 = tpu.matmul %124, %11, %cst_37 {dimension_numbers = #tpu.dot_dimension_numbers<[1], [0], [0], [1], [0, 0, 1, 1], [], []>} : vector<8x128xf32>, vector<128x384xf32>, vector<8x384xf32> -> vector<8x384xf32>
    %128 = arith.index_cast %126 : i32 to index
    %c0_38 = arith.constant 0 : index
    %129 = vector.load %arg11[%128, %c0_38] : memref<64x384xf32, #tpu.memory_space<vmem>>, vector<8x384xf32>
    %130 = vector.extract_strided_slice %129 {offsets = [0, 0], sizes = [8, 128], strides = [1, 1]} : vector<8x384xf32> to vector<8x128xf32>
    %131 = vector.extract_strided_slice %127 {offsets = [0, 0], sizes = [8, 128], strides = [1, 1]} : vector<8x384xf32> to vector<8x128xf32>
    %132 = arith.addf %130, %131 : vector<8x128xf32>
    %133 = arith.negf %132 : vector<8x128xf32>
    %134 = math.exp %133 : vector<8x128xf32>
    %cst_39 = arith.constant 1.000000e+00 : f32
    %135 = vector.broadcast %cst_39 : f32 to vector<8x128xf32>
    %136 = arith.addf %135, %134 : vector<8x128xf32>
    %137 = arith.divf %135, %136 : vector<8x128xf32>
    %138 = vector.extract_strided_slice %129 {offsets = [0, 128], sizes = [8, 128], strides = [1, 1]} : vector<8x384xf32> to vector<8x128xf32>
    %139 = vector.extract_strided_slice %127 {offsets = [0, 128], sizes = [8, 128], strides = [1, 1]} : vector<8x384xf32> to vector<8x128xf32>
    %140 = arith.addf %138, %139 : vector<8x128xf32>
    %141 = arith.negf %140 : vector<8x128xf32>
    %142 = math.exp %141 : vector<8x128xf32>
    %cst_40 = arith.constant 1.000000e+00 : f32
    %143 = vector.broadcast %cst_40 : f32 to vector<8x128xf32>
    %144 = arith.addf %143, %142 : vector<8x128xf32>
    %145 = arith.divf %143, %144 : vector<8x128xf32>
    %146 = vector.extract_strided_slice %129 {offsets = [0, 256], sizes = [8, 128], strides = [1, 1]} : vector<8x384xf32> to vector<8x128xf32>
    %147 = vector.extract_strided_slice %127 {offsets = [0, 256], sizes = [8, 128], strides = [1, 1]} : vector<8x384xf32> to vector<8x128xf32>
    %148 = vector.broadcast %12 : vector<1x128xf32> to vector<8x128xf32>
    %149 = arith.addf %147, %148 : vector<8x128xf32>
    %150 = arith.mulf %137, %149 : vector<8x128xf32>
    %151 = arith.addf %146, %150 : vector<8x128xf32>
    %152 = math.tanh %151 : vector<8x128xf32>
    %153 = vector.broadcast %18 : vector<1x128xf32> to vector<8x128xf32>
    %154 = arith.mulf %153, %145 : vector<8x128xf32>
    %cst_41 = arith.constant 1.000000e+00 : f32
    %155 = vector.broadcast %cst_41 : f32 to vector<8x128xf32>
    %156 = arith.subf %155, %154 : vector<8x128xf32>
    %157 = arith.mulf %156, %152 : vector<8x128xf32>
    %158 = arith.mulf %154, %124 : vector<8x128xf32>
    %159 = arith.addf %157, %158 : vector<8x128xf32>
    %c4_i32 = arith.constant 4 : i32
    %c8_i32_42 = arith.constant 8 : i32
    %160 = arith.muli %c4_i32, %c8_i32_42 : i32
    %161 = tpu.assume_multiple %160, 8 : i32
    %cst_43 = arith.constant dense<0.000000e+00> : vector<8x384xf32>
    %162 = tpu.matmul %159, %11, %cst_43 {dimension_numbers = #tpu.dot_dimension_numbers<[1], [0], [0], [1], [0, 0, 1, 1], [], []>} : vector<8x128xf32>, vector<128x384xf32>, vector<8x384xf32> -> vector<8x384xf32>
    %163 = arith.index_cast %161 : i32 to index
    %c0_44 = arith.constant 0 : index
    %164 = vector.load %arg11[%163, %c0_44] : memref<64x384xf32, #tpu.memory_space<vmem>>, vector<8x384xf32>
    %165 = vector.extract_strided_slice %164 {offsets = [0, 0], sizes = [8, 128], strides = [1, 1]} : vector<8x384xf32> to vector<8x128xf32>
    %166 = vector.extract_strided_slice %162 {offsets = [0, 0], sizes = [8, 128], strides = [1, 1]} : vector<8x384xf32> to vector<8x128xf32>
    %167 = arith.addf %165, %166 : vector<8x128xf32>
    %168 = arith.negf %167 : vector<8x128xf32>
    %169 = math.exp %168 : vector<8x128xf32>
    %cst_45 = arith.constant 1.000000e+00 : f32
    %170 = vector.broadcast %cst_45 : f32 to vector<8x128xf32>
    %171 = arith.addf %170, %169 : vector<8x128xf32>
    %172 = arith.divf %170, %171 : vector<8x128xf32>
    %173 = vector.extract_strided_slice %164 {offsets = [0, 128], sizes = [8, 128], strides = [1, 1]} : vector<8x384xf32> to vector<8x128xf32>
    %174 = vector.extract_strided_slice %162 {offsets = [0, 128], sizes = [8, 128], strides = [1, 1]} : vector<8x384xf32> to vector<8x128xf32>
    %175 = arith.addf %173, %174 : vector<8x128xf32>
    %176 = arith.negf %175 : vector<8x128xf32>
    %177 = math.exp %176 : vector<8x128xf32>
    %cst_46 = arith.constant 1.000000e+00 : f32
    %178 = vector.broadcast %cst_46 : f32 to vector<8x128xf32>
    %179 = arith.addf %178, %177 : vector<8x128xf32>
    %180 = arith.divf %178, %179 : vector<8x128xf32>
    %181 = vector.extract_strided_slice %164 {offsets = [0, 256], sizes = [8, 128], strides = [1, 1]} : vector<8x384xf32> to vector<8x128xf32>
    %182 = vector.extract_strided_slice %162 {offsets = [0, 256], sizes = [8, 128], strides = [1, 1]} : vector<8x384xf32> to vector<8x128xf32>
    %183 = vector.broadcast %12 : vector<1x128xf32> to vector<8x128xf32>
    %184 = arith.addf %182, %183 : vector<8x128xf32>
    %185 = arith.mulf %172, %184 : vector<8x128xf32>
    %186 = arith.addf %181, %185 : vector<8x128xf32>
    %187 = math.tanh %186 : vector<8x128xf32>
    %188 = vector.broadcast %18 : vector<1x128xf32> to vector<8x128xf32>
    %189 = arith.mulf %188, %180 : vector<8x128xf32>
    %cst_47 = arith.constant 1.000000e+00 : f32
    %190 = vector.broadcast %cst_47 : f32 to vector<8x128xf32>
    %191 = arith.subf %190, %189 : vector<8x128xf32>
    %192 = arith.mulf %191, %187 : vector<8x128xf32>
    %193 = arith.mulf %189, %159 : vector<8x128xf32>
    %194 = arith.addf %192, %193 : vector<8x128xf32>
    %c5_i32 = arith.constant 5 : i32
    %c8_i32_48 = arith.constant 8 : i32
    %195 = arith.muli %c5_i32, %c8_i32_48 : i32
    %196 = tpu.assume_multiple %195, 8 : i32
    %cst_49 = arith.constant dense<0.000000e+00> : vector<8x384xf32>
    %197 = tpu.matmul %194, %11, %cst_49 {dimension_numbers = #tpu.dot_dimension_numbers<[1], [0], [0], [1], [0, 0, 1, 1], [], []>} : vector<8x128xf32>, vector<128x384xf32>, vector<8x384xf32> -> vector<8x384xf32>
    %198 = arith.index_cast %196 : i32 to index
    %c0_50 = arith.constant 0 : index
    %199 = vector.load %arg11[%198, %c0_50] : memref<64x384xf32, #tpu.memory_space<vmem>>, vector<8x384xf32>
    %200 = vector.extract_strided_slice %199 {offsets = [0, 0], sizes = [8, 128], strides = [1, 1]} : vector<8x384xf32> to vector<8x128xf32>
    %201 = vector.extract_strided_slice %197 {offsets = [0, 0], sizes = [8, 128], strides = [1, 1]} : vector<8x384xf32> to vector<8x128xf32>
    %202 = arith.addf %200, %201 : vector<8x128xf32>
    %203 = arith.negf %202 : vector<8x128xf32>
    %204 = math.exp %203 : vector<8x128xf32>
    %cst_51 = arith.constant 1.000000e+00 : f32
    %205 = vector.broadcast %cst_51 : f32 to vector<8x128xf32>
    %206 = arith.addf %205, %204 : vector<8x128xf32>
    %207 = arith.divf %205, %206 : vector<8x128xf32>
    %208 = vector.extract_strided_slice %199 {offsets = [0, 128], sizes = [8, 128], strides = [1, 1]} : vector<8x384xf32> to vector<8x128xf32>
    %209 = vector.extract_strided_slice %197 {offsets = [0, 128], sizes = [8, 128], strides = [1, 1]} : vector<8x384xf32> to vector<8x128xf32>
    %210 = arith.addf %208, %209 : vector<8x128xf32>
    %211 = arith.negf %210 : vector<8x128xf32>
    %212 = math.exp %211 : vector<8x128xf32>
    %cst_52 = arith.constant 1.000000e+00 : f32
    %213 = vector.broadcast %cst_52 : f32 to vector<8x128xf32>
    %214 = arith.addf %213, %212 : vector<8x128xf32>
    %215 = arith.divf %213, %214 : vector<8x128xf32>
    %216 = vector.extract_strided_slice %199 {offsets = [0, 256], sizes = [8, 128], strides = [1, 1]} : vector<8x384xf32> to vector<8x128xf32>
    %217 = vector.extract_strided_slice %197 {offsets = [0, 256], sizes = [8, 128], strides = [1, 1]} : vector<8x384xf32> to vector<8x128xf32>
    %218 = vector.broadcast %12 : vector<1x128xf32> to vector<8x128xf32>
    %219 = arith.addf %217, %218 : vector<8x128xf32>
    %220 = arith.mulf %207, %219 : vector<8x128xf32>
    %221 = arith.addf %216, %220 : vector<8x128xf32>
    %222 = math.tanh %221 : vector<8x128xf32>
    %223 = vector.broadcast %18 : vector<1x128xf32> to vector<8x128xf32>
    %224 = arith.mulf %223, %215 : vector<8x128xf32>
    %cst_53 = arith.constant 1.000000e+00 : f32
    %225 = vector.broadcast %cst_53 : f32 to vector<8x128xf32>
    %226 = arith.subf %225, %224 : vector<8x128xf32>
    %227 = arith.mulf %226, %222 : vector<8x128xf32>
    %228 = arith.mulf %224, %194 : vector<8x128xf32>
    %229 = arith.addf %227, %228 : vector<8x128xf32>
    %c6_i32 = arith.constant 6 : i32
    %c8_i32_54 = arith.constant 8 : i32
    %230 = arith.muli %c6_i32, %c8_i32_54 : i32
    %231 = tpu.assume_multiple %230, 8 : i32
    %cst_55 = arith.constant dense<0.000000e+00> : vector<8x384xf32>
    %232 = tpu.matmul %229, %11, %cst_55 {dimension_numbers = #tpu.dot_dimension_numbers<[1], [0], [0], [1], [0, 0, 1, 1], [], []>} : vector<8x128xf32>, vector<128x384xf32>, vector<8x384xf32> -> vector<8x384xf32>
    %233 = arith.index_cast %231 : i32 to index
    %c0_56 = arith.constant 0 : index
    %234 = vector.load %arg11[%233, %c0_56] : memref<64x384xf32, #tpu.memory_space<vmem>>, vector<8x384xf32>
    %235 = vector.extract_strided_slice %234 {offsets = [0, 0], sizes = [8, 128], strides = [1, 1]} : vector<8x384xf32> to vector<8x128xf32>
    %236 = vector.extract_strided_slice %232 {offsets = [0, 0], sizes = [8, 128], strides = [1, 1]} : vector<8x384xf32> to vector<8x128xf32>
    %237 = arith.addf %235, %236 : vector<8x128xf32>
    %238 = arith.negf %237 : vector<8x128xf32>
    %239 = math.exp %238 : vector<8x128xf32>
    %cst_57 = arith.constant 1.000000e+00 : f32
    %240 = vector.broadcast %cst_57 : f32 to vector<8x128xf32>
    %241 = arith.addf %240, %239 : vector<8x128xf32>
    %242 = arith.divf %240, %241 : vector<8x128xf32>
    %243 = vector.extract_strided_slice %234 {offsets = [0, 128], sizes = [8, 128], strides = [1, 1]} : vector<8x384xf32> to vector<8x128xf32>
    %244 = vector.extract_strided_slice %232 {offsets = [0, 128], sizes = [8, 128], strides = [1, 1]} : vector<8x384xf32> to vector<8x128xf32>
    %245 = arith.addf %243, %244 : vector<8x128xf32>
    %246 = arith.negf %245 : vector<8x128xf32>
    %247 = math.exp %246 : vector<8x128xf32>
    %cst_58 = arith.constant 1.000000e+00 : f32
    %248 = vector.broadcast %cst_58 : f32 to vector<8x128xf32>
    %249 = arith.addf %248, %247 : vector<8x128xf32>
    %250 = arith.divf %248, %249 : vector<8x128xf32>
    %251 = vector.extract_strided_slice %234 {offsets = [0, 256], sizes = [8, 128], strides = [1, 1]} : vector<8x384xf32> to vector<8x128xf32>
    %252 = vector.extract_strided_slice %232 {offsets = [0, 256], sizes = [8, 128], strides = [1, 1]} : vector<8x384xf32> to vector<8x128xf32>
    %253 = vector.broadcast %12 : vector<1x128xf32> to vector<8x128xf32>
    %254 = arith.addf %252, %253 : vector<8x128xf32>
    %255 = arith.mulf %242, %254 : vector<8x128xf32>
    %256 = arith.addf %251, %255 : vector<8x128xf32>
    %257 = math.tanh %256 : vector<8x128xf32>
    %258 = vector.broadcast %18 : vector<1x128xf32> to vector<8x128xf32>
    %259 = arith.mulf %258, %250 : vector<8x128xf32>
    %cst_59 = arith.constant 1.000000e+00 : f32
    %260 = vector.broadcast %cst_59 : f32 to vector<8x128xf32>
    %261 = arith.subf %260, %259 : vector<8x128xf32>
    %262 = arith.mulf %261, %257 : vector<8x128xf32>
    %263 = arith.mulf %259, %229 : vector<8x128xf32>
    %264 = arith.addf %262, %263 : vector<8x128xf32>
    %c7_i32 = arith.constant 7 : i32
    %c8_i32_60 = arith.constant 8 : i32
    %265 = arith.muli %c7_i32, %c8_i32_60 : i32
    %266 = tpu.assume_multiple %265, 8 : i32
    %cst_61 = arith.constant dense<0.000000e+00> : vector<8x384xf32>
    %267 = tpu.matmul %264, %11, %cst_61 {dimension_numbers = #tpu.dot_dimension_numbers<[1], [0], [0], [1], [0, 0, 1, 1], [], []>} : vector<8x128xf32>, vector<128x384xf32>, vector<8x384xf32> -> vector<8x384xf32>
    %268 = arith.index_cast %266 : i32 to index
    %c0_62 = arith.constant 0 : index
    %269 = vector.load %arg11[%268, %c0_62] : memref<64x384xf32, #tpu.memory_space<vmem>>, vector<8x384xf32>
    %270 = vector.extract_strided_slice %269 {offsets = [0, 0], sizes = [8, 128], strides = [1, 1]} : vector<8x384xf32> to vector<8x128xf32>
    %271 = vector.extract_strided_slice %267 {offsets = [0, 0], sizes = [8, 128], strides = [1, 1]} : vector<8x384xf32> to vector<8x128xf32>
    %272 = arith.addf %270, %271 : vector<8x128xf32>
    %273 = arith.negf %272 : vector<8x128xf32>
    %274 = math.exp %273 : vector<8x128xf32>
    %cst_63 = arith.constant 1.000000e+00 : f32
    %275 = vector.broadcast %cst_63 : f32 to vector<8x128xf32>
    %276 = arith.addf %275, %274 : vector<8x128xf32>
    %277 = arith.divf %275, %276 : vector<8x128xf32>
    %278 = vector.extract_strided_slice %269 {offsets = [0, 128], sizes = [8, 128], strides = [1, 1]} : vector<8x384xf32> to vector<8x128xf32>
    %279 = vector.extract_strided_slice %267 {offsets = [0, 128], sizes = [8, 128], strides = [1, 1]} : vector<8x384xf32> to vector<8x128xf32>
    %280 = arith.addf %278, %279 : vector<8x128xf32>
    %281 = arith.negf %280 : vector<8x128xf32>
    %282 = math.exp %281 : vector<8x128xf32>
    %cst_64 = arith.constant 1.000000e+00 : f32
    %283 = vector.broadcast %cst_64 : f32 to vector<8x128xf32>
    %284 = arith.addf %283, %282 : vector<8x128xf32>
    %285 = arith.divf %283, %284 : vector<8x128xf32>
    %286 = vector.extract_strided_slice %269 {offsets = [0, 256], sizes = [8, 128], strides = [1, 1]} : vector<8x384xf32> to vector<8x128xf32>
    %287 = vector.extract_strided_slice %267 {offsets = [0, 256], sizes = [8, 128], strides = [1, 1]} : vector<8x384xf32> to vector<8x128xf32>
    %288 = vector.broadcast %12 : vector<1x128xf32> to vector<8x128xf32>
    %289 = arith.addf %287, %288 : vector<8x128xf32>
    %290 = arith.mulf %277, %289 : vector<8x128xf32>
    %291 = arith.addf %286, %290 : vector<8x128xf32>
    %292 = math.tanh %291 : vector<8x128xf32>
    %293 = vector.broadcast %18 : vector<1x128xf32> to vector<8x128xf32>
    %294 = arith.mulf %293, %285 : vector<8x128xf32>
    %cst_65 = arith.constant 1.000000e+00 : f32
    %295 = vector.broadcast %cst_65 : f32 to vector<8x128xf32>
    %296 = arith.subf %295, %294 : vector<8x128xf32>
    %297 = arith.mulf %296, %292 : vector<8x128xf32>
    %298 = arith.mulf %294, %264 : vector<8x128xf32>
    %299 = arith.addf %297, %298 : vector<8x128xf32>
    %c8_i32_66 = arith.constant 8 : i32
    %c0_67 = arith.constant 0 : index
    %c0_68 = arith.constant 0 : index
    %300 = vector.load %arg12[%c0_67, %c0_68] : memref<8x128xf32, #tpu.memory_space<vmem>>, vector<8x128xf32>
    tpu.vector_store %arg12[%c0_67, %c0_68], %299 {strides = array<i32>} : memref<8x128xf32, #tpu.memory_space<vmem>>, vector<8x128xf32>,
    %c0_i32_69 = arith.constant 0 : i32
    %301 = arith.cmpi eq, %arg1, %c0_i32_69 : i32
    %302 = arith.extui %301 : i1 to i32
    %c0_i32_70 = arith.constant 0 : i32
    %303 = arith.cmpi ne, %302, %c0_i32_70 : i32
    scf.if %303 {
      %c0_71 = arith.constant 0 : index
      %c0_72 = arith.constant 0 : index
      %304 = vector.load %arg12[%c0_71, %c0_72] : memref<8x128xf32, #tpu.memory_space<vmem>>, vector<8x128xf32>
      %c0_73 = arith.constant 0 : index
      %c0_74 = arith.constant 0 : index
      %305 = vector.load %arg8[%c0_73, %c0_74] : memref<128x128xf32, #tpu.memory_space<vmem>>, vector<128x128xf32>
      %cst_75 = arith.constant dense<0.000000e+00> : vector<8x128xf32>
      %306 = tpu.matmul %304, %305, %cst_75 {dimension_numbers = #tpu.dot_dimension_numbers<[1], [0], [0], [1], [0, 0, 1, 1], [], []>} : vector<8x128xf32>, vector<128x128xf32>, vector<8x128xf32> -> vector<8x128xf32>
      %c0_76 = arith.constant 0 : index
      %c0_77 = arith.constant 0 : index
      %307 = vector.load %arg9[%c0_76, %c0_77] : memref<1x128xf32, #tpu.memory_space<vmem>>, vector<1x128xf32>
      %308 = vector.broadcast %307 : vector<1x128xf32> to vector<8x128xf32>
      %309 = arith.addf %306, %308 : vector<8x128xf32>
      %310 = arith.negf %309 : vector<8x128xf32>
      %311 = math.exp %310 : vector<8x128xf32>
      %cst_78 = arith.constant 1.000000e+00 : f32
      %312 = vector.broadcast %cst_78 : f32 to vector<8x128xf32>
      %313 = arith.addf %312, %311 : vector<8x128xf32>
      %314 = arith.divf %312, %313 : vector<8x128xf32>
      %c0_79 = arith.constant 0 : index
      %c0_80 = arith.constant 0 : index
      %315 = vector.load %arg10[%c0_79, %c0_80] : memref<8x128xf32, #tpu.memory_space<vmem>>, vector<8x128xf32>
      tpu.vector_store %arg10[%c0_79, %c0_80], %314 {strides = array<i32>} : memref<8x128xf32, #tpu.memory_space<vmem>>, vector<8x128xf32>,
    } else {
    }
    return
  }
  func.func @transform_0(%arg0: i32, %arg1: i32) -> (i32, i32, i32) {
    %c0_i32 = arith.constant 0 : i32
    %c0_i32_0 = arith.constant 0 : i32
    return %arg0, %arg1, %c0_i32 : i32, i32, i32
  }
  func.func @transform_1(%arg0: i32, %arg1: i32) -> (i32, i32) {
    %c0_i32 = arith.constant 0 : i32
    %c0_i32_0 = arith.constant 0 : i32
    %c0_i32_1 = arith.constant 0 : i32
    return %c0_i32, %c0_i32_0 : i32, i32
  }
  func.func @transform_2(%arg0: i32, %arg1: i32) -> (i32, i32) {
    %c0_i32 = arith.constant 0 : i32
    %c0_i32_0 = arith.constant 0 : i32
    %c0_i32_1 = arith.constant 0 : i32
    return %c0_i32, %c0_i32_0 : i32, i32
  }
  func.func @transform_3(%arg0: i32, %arg1: i32) -> (i32, i32) {
    %c0_i32 = arith.constant 0 : i32
    %c0_i32_0 = arith.constant 0 : i32
    %c0_i32_1 = arith.constant 0 : i32
    return %c0_i32, %c0_i32_0 : i32, i32
  }
  func.func @transform_4(%arg0: i32, %arg1: i32) -> (i32, i32) {
    %c0_i32 = arith.constant 0 : i32
    %c0_i32_0 = arith.constant 0 : i32
    %c0_i32_1 = arith.constant 0 : i32
    return %c0_i32, %c0_i32_0 : i32, i32
  }
  func.func @transform_5(%arg0: i32, %arg1: i32) -> (i32, i32) {
    %c0_i32 = arith.constant 0 : i32
    %c0_i32_0 = arith.constant 0 : i32
    %c0_i32_1 = arith.constant 0 : i32
    return %c0_i32, %c0_i32_0 : i32, i32
  }
  func.func @transform_6(%arg0: i32, %arg1: i32) -> (i32, i32) {
    %c0_i32 = arith.constant 0 : i32
    %c0_i32_0 = arith.constant 0 : i32
    %c0_i32_1 = arith.constant 0 : i32
    return %c0_i32, %c0_i32_0 : i32, i32
  }
  func.func @transform_7(%arg0: i32, %arg1: i32) -> (i32, i32) {
    %c0_i32 = arith.constant 0 : i32
    %c0_i32_0 = arith.constant 0 : i32
    %c0_i32_1 = arith.constant 0 : i32
    return %c0_i32, %c0_i32_0 : i32, i32
  }
  func.func @transform_8(%arg0: i32, %arg1: i32) -> (i32, i32) {
    %c0_i32 = arith.constant 0 : i32
    %c0_i32_0 = arith.constant 0 : i32
    return %arg0, %c0_i32 : i32, i32
  }
}

</mosaic_0001>

<bundles_post_ra>
// kernel: tpu_custom_call.1
= control target key start
LH: loop header
LB: loop body
LE: loop exit
PB: predicated region body
PF: predicated region fallthrough
CT: control target
= control target key end

     0   :  { %13 = vsyncpa [#allocation5], 0  ;;  %s3730_s0 = inlined_call_operand.vmem [shape: f32[1,64,16], index: 0, kind: input, shape index: {}]   ;;  %s3731_s1 = inlined_call_operand.vmem [shape: f32[16,384], index: 1, kind: input, shape index: {}]   ;;  %s3732_s2 = inlined_call_operand.hbm [shape: f32[128,384], index: 2, kind: input, shape index: {}]   ;;  %s3733_s3 = inlined_call_operand.vmem [shape: f32[1,384], index: 3, kind: input, shape index: {}]   ;;  %s3734_s4 = inlined_call_operand.vmem [shape: f32[1,128], index: 4, kind: input, shape index: {}]   ;;  %s3735_s5 = inlined_call_operand.vmem [shape: f32[1,128], index: 5, kind: input, shape index: {}]   ;;  %s3736_s6 = inlined_call_operand.hbm [shape: f32[128,128], index: 6, kind: input, shape index: {}]   ;;  %s3737_s7 = inlined_call_operand.vmem [shape: f32[1,128], index: 7, kind: input, shape index: {}]   ;;  %s3738_s8 = inlined_call_operand.hbm [shape: f32[8,128], index: 8, kind: output, shape index: {}]  }
   0x1   :  { %14 = vsyncpa [#allocation8], 0 }
   0x2   :  { %15 = vsyncpa [#allocation6], 0  ;;  %s3130_s27 = smov [#allocation4]   ;;  %s3058_s9 = scalar_lea.hbm %s3732_s2, 6144 }
   0x3   :  { %s25_s28 = sshll.u32 %s3130_s27, 4  ;;  %p3059_p0 = scmp.ne.s32.totalorder %s3732_s2, %s3058_s9  ;;  %s26_s28 = int_to_ptr.vmem [resolvable:$true] %s25_s28 }
   0x4   :  { %p3062_p1 = scmp.lt.u32.totalorder %s3058_s9, %s3732_s2 }
   0x6   :  { %p3064_p2 = pnand %p3062_p1, %p3059_p0 }
   0x8   :  { %3067 = shalt.err (!%p3064_p2)
}
   0x9   :  { %s3068_s14 = scalar_lea.vmem %s26_s28, 6144  ;;  %p3073_p4 = scmp.lt.s32.totalorder %s26_s28, %s26_s28 }
   0xa   :  { %p3069_p3 = scmp.ne.s32.totalorder %s26_s28, %s3068_s14  ;;  %p3074_p5 = scmp.lt.s32.totalorder %s3068_s14, %s3068_s14 }
   0xc   :  { %p3075_p6 = por %p3074_p5, %p3073_p4 }
   0xe   :  { %p3076_p7 = pnand %p3075_p6, %p3069_p3 }
  0x10   :  { %3079 = shalt.err (!%p3076_p7)
}
  0x11   :  { %s3131_s15 = smov 384   ;;  %s3132_s16 = smov 24  }
  0x12   :  { %31 = dma.hbm_to_vmem [thread:$0]  %s3732_s2, 6144, %s26_s28, [#allocation5], %s3131_s15, %s3131_s15, %s3132_s16  }
  0x13   :  { %s3133_s19 = smov [#allocation7]   ;;  %s3080_s23 = scalar_lea.hbm %s3736_s6, 2048 }
  0x14   :  { %s43_s20 = sshll.u32 %s3133_s19, 4  ;;  %p3081_p8 = scmp.ne.s32.totalorder %s3736_s6, %s3080_s23  ;;  %s44_s20 = int_to_ptr.vmem [resolvable:$true] %s43_s20 }
  0x15   :  { %p3084_p9 = scmp.lt.u32.totalorder %s3080_s23, %s3736_s6 }
  0x17   :  { %p3086_p10 = pnand %p3084_p9, %p3081_p8 }
  0x19   :  { %3089 = shalt.err (!%p3086_p10)
}
  0x1a   :  { %s3090_s29 = scalar_lea.vmem %s44_s20, 2048  ;;  %p3095_p12 = scmp.lt.s32.totalorder %s44_s20, %s44_s20 }
  0x1b   :  { %p3091_p11 = scmp.ne.s32.totalorder %s44_s20, %s3090_s29  ;;  %p3096_p13 = scmp.lt.s32.totalorder %s3090_s29, %s3090_s29 }
  0x1d   :  { %p3097_p0 = por %p3096_p13, %p3095_p12 }
  0x1f   :  { %p3098_p1 = pnand %p3097_p0, %p3091_p11 }
  0x21   :  { %3101 = shalt.err (!%p3098_p1)
}
  0x22   :  { %s3134_s2 = smov 128   ;;  %s3135_s28 = smov 8  }
  0x23   :  { %49 = dma.hbm_to_vmem [thread:$0]  %s3736_s6, 2048, %s44_s20, [#allocation8], %s3134_s2, %s3134_s2, %s3135_s28  }
  0x24   :  { %3124 = dma.done.wait [#allocation5], 6144  }
  0x25   :  { %3125 = vsyncadd [#allocation5], 4294961152 }
  0x26   :  { %3126 = dma.done.wait [#allocation8], 2048  }
  0x27   :  { %3127 = vsyncadd [#allocation8], 4294965248  ;;  %v3136_v0 = vmov 0.0   ;;  %v72_v1 = vld [vmem:[%s3731_s1 + $0x8] sm:$0xff]  ;;  %v75_v2 = vld [vmem:[%s3731_s1 + $0x20] sm:$0xff]  ;;  %vm94_vm0 = vcmask 130048  }
  0x28   :  { %183 = vmatprep.mubr.f32.mxu0 %v3136_v0  ;;  %v71_v3 = vld [vmem:[%s3731_s1] sm:$0xff]  ;;  %v2448_v4 = vpack.c.bf16 %v75_v2, %v72_v1  ;;  %v74_v5 = vld [vmem:[%s3731_s1 + $0x18] sm:$0xff]  ;;  %v365_v9 = vld [vmem:[#allocation4 + $0x20] sm:$0xff]  ;;  %v3137_v48 = vmov 0.0|0.0   ;;  %vm3138_vm1 = vmmov 0   ;;  %s3139_s16 = smov [#allocation9]  }
  0x29   :  { %v63_v6 = vld [vmem:[%s3730_s0] sm:$0xff]  ;;  %v362_v7 = vld [vmem:[#allocation4 + $0x8] sm:$0xff]  ;;  %v2450_v8 = vpack.c.bf16 %v74_v5, %v71_v3  ;;  %v361_v10 = vld [vmem:[#allocation4] sm:$0xff]  ;;  %s1901_s17 = sshll.u32 %s3139_s16, 4  ;;  %s1902_s17 = int_to_ptr.vmem [resolvable:$true] %s1901_s17 }
  0x2a   :  { %v364_v11 = vld [vmem:[#allocation4 + $0x18] sm:$0xff]  ;;  %2121 = vmatprep.mubr.msk.f32.mxu1 %vm94_vm0, %v63_v6  ;;  %2449 = vmatprep.subr.bf16.mxu0 %v2448_v4  ;;  %v3226_v12 = vpack.c.bf16 %v365_v9, %v362_v7  ;;  %v371_v14 = vld [vmem:[#allocation4 + $0x50] sm:$0xff]  ;;  %v370_v18 = vld [vmem:[#allocation4 + $0x48] sm:$0xff]  ;;  %s3102_s18 = scalar_lea.vmem %s1902_s17, 128  ;;  %p3107_p3 = scmp.lt.s32.totalorder %s1902_s17, %s1902_s17 }
  0x2b   :  { %v368_v13 = vld [vmem:[#allocation4 + $0x38] sm:$0xff]  ;;  %2451 = vmatpush1.bf16.msra.mxu0 %v2450_v8  ;;  %v3228_v15 = vpack.c.bf16 %v364_v11, %v361_v10  ;;  %v367_v17 = vld [vmem:[#allocation4 + $0x30] sm:$0xff]  ;;  %v374_v19 = vld [vmem:[#allocation4 + $0x68] sm:$0xff]  ;;  %p3103_p2 = scmp.ne.s32.totalorder %s1902_s17, %s3102_s18  ;;  %p3108_p4 = scmp.lt.s32.totalorder %s3102_s18, %s3102_s18 }
  0x2c   :  { %2457 = vmatprep.subr.bf16.mxu0 %v3226_v12  ;;  %v3231_v16 = vpack.c.bf16 %v371_v14, %v368_v13  ;;  %v377_v20 = vld [vmem:[#allocation4 + $0x80] sm:$0xff]  ;;  %v64_v21 = vld [vmem:[%s3730_s0 + $0x8] sm:$0xff]  ;;  %v3239_v22 = vpack.c.bf16 %v370_v18, %v367_v17  ;;  %v383_v27 = vld [vmem:[#allocation4 + $0xb0] sm:$0xff] }
  0x2d   :  { %v3242_v23 = vpack.c.bf16 %v377_v20, %v374_v19  ;;  %v373_v24 = vld [vmem:[#allocation4 + $0x60] sm:$0xff]  ;;  %v376_v25 = vld [vmem:[#allocation4 + $0x78] sm:$0xff]  ;;  %v379_v34 = vld [vmem:[#allocation4 + $0x90] sm:$0xff]  ;;  %p3109_p5 = por %p3108_p4, %p3107_p3 }
  0x2e   :  { %1918 = vmatmul.mubr.msk.f32.vlgmr.msra.gmra.mrb[0].mxu0 %vm94_vm0, %v63_v6  ;;  %v380_v26 = vld [vmem:[#allocation4 + $0x98] sm:$0xff]  ;;  %v73_v28 = vld [vmem:[%s3731_s1 + $0x10] sm:$0xff]  ;;  %v3256_v31 = vpack.c.bf16 %v376_v25, %v373_v24  ;;  %v382_v35 = vld [vmem:[#allocation4 + $0xa8] sm:$0xff] }
  0x2f   :  { %2459 = vmatpush1.bf16.msra.mxu0 %v3228_v15  ;;  %189 = vmatprep.mubr.f32.mxu0 %v3136_v0  ;;  %v76_v29 = vld [vmem:[%s3731_s1 + $0x28] sm:$0xff]  ;;  %v65_v30 = vld [vmem:[%s3730_s0 + $0x10] sm:$0xff]  ;;  %v3259_v33 = vpack.c.bf16 %v383_v27, %v380_v26  ;;  %v363_v36 = vld [vmem:[#allocation4 + $0x10] sm:$0xff]  ;;  %v3269_v42 = vpack.c.bf16 %v382_v35, %v379_v34  ;;  %v79_v35 = vlaneseq  ;;  %p3110_p6 = pnand %p3109_p5, %p3103_p2 }
  0x30   :  { %2461 = vmatprep.subr.bf16.mxu0 %v3231_v16  ;;  %v2452_v32 = vpack.c.bf16 %v76_v29, %v73_v28  ;;  %v386_v37 = vld [vmem:[#allocation4 + $0xc8] sm:$0xff]  ;;  %v389_v38 = vld [vmem:[#allocation4 + $0xe0] sm:$0xff]  ;;  %v372_v44 = vld [vmem:[#allocation4 + $0x58] sm:$0xff] }
  0x31   :  { %v366_v39 = vld [vmem:[#allocation4 + $0x28] sm:$0xff]  ;;  %v369_v43 = vld [vmem:[#allocation4 + $0x40] sm:$0xff]  ;;  %v3272_v45 = vpack.c.bf16 %v389_v38, %v386_v37  ;;  %v388_v47 = vld [vmem:[#allocation4 + $0xd8] sm:$0xff] }
  0x32   :  { %1919 = vmatmul.mubr.msk.f32.gmra.mrb[2].mxu0 %vm94_vm0, %v64_v21  ;;  %2453 = vmatprep.subr.bf16.mxu1 %v2452_v32  ;;  %v3262_v40 = vpack.c.bf16 %v366_v39, %v363_v36  ;;  %v66_v41 = vld [vmem:[%s3730_s0 + $0x18] sm:$0xff]  ;;  %v385_v46 = vld [vmem:[#allocation4 + $0xc0] sm:$0xff]  ;;  %v392_v49 = vld [vmem:[#allocation4 + $0xf8] sm:$0xff]  ;;  %v3278_v51 = vpack.c.bf16 %v372_v44, %v369_v43  ;;  %v80_v36 = vshrl.u32 %v79_v35, 7 }
  0x33   :  { %2463 = vmatpush1.bf16.msra.mxu0 %v3239_v22  ;;  %195 = vmatprep.mubr.f32.mxu0 %v3136_v0  ;;  %v395_v50 = vld [vmem:[#allocation4 + $0x110] sm:$0xff]  ;;  %v3285_v53 = vpack.c.bf16 %v388_v47, %v385_v46  ;;  %v378_v55 = vld [vmem:[#allocation4 + $0x88] sm:$0xff]  ;;  %v401_v60 = vld [vmem:[#allocation4 + $0x140] sm:$0xff] }
  0x34   :  { %2465 = vmatprep.subr.bf16.mxu0 %v3242_v23  ;;  %2455 = vmatpush3.bf16.msra.mxu1 %v2452_v32  ;;  %v67_v52 = vld [vmem:[%s3730_s0 + $0x20] sm:$0xff]  ;;  %v3288_v56 = vpack.c.bf16 %v395_v50, %v392_v49  ;;  %v394_v58 = vld [vmem:[#allocation4 + $0x108] sm:$0xff]  ;;  %v68_v62 = vld [vmem:[%s3730_s0 + $0x28] sm:$0xff]  ;;  %v89_v37 = vsub.s32 2, %v80_v36 }
  0x35   :  { %2488 = vmatprep.subr.bf16.mxu1 %v3137_v48  ;;  %v375_v54 = vld [vmem:[#allocation4 + $0x70] sm:$0xff]  ;;  %v398_v59 = vld [vmem:[#allocation4 + $0x128] sm:$0xff]  ;;  %v381_v1 = vld [vmem:[#allocation4 + $0xa0] sm:$0xff] }
  0x36   :  { %1920 = vmatmul.mubr.msk.f32.gmra.mrb[4].mxu0 %vm94_vm0, %v65_v30  ;;  %v391_v57 = vld [vmem:[#allocation4 + $0xf0] sm:$0xff]  ;;  %v3294_v61 = vpack.c.bf16 %v378_v55, %v375_v54  ;;  %v384_v2 = vld [vmem:[#allocation4 + $0xb8] sm:$0xff]  ;;  %v3304_v3 = vpack.c.bf16 %v401_v60, %v398_v59  ;;  %v397_v4 = vld [vmem:[#allocation4 + $0x120] sm:$0xff]  ;;  %v85_v54 = vsub.s32 1, %v80_v36 }
  0x37   :  { %2467 = vmatpush1.bf16.msra.mxu0 %v3256_v31  ;;  %201 = vmatprep.mubr.f32.mxu0 %v3136_v0  ;;  %v3301_v63 = vpack.c.bf16 %v394_v58, %v391_v57  ;;  %v400_v5 = vld [vmem:[#allocation4 + $0x138] sm:$0xff]  ;;  %v407_v7 = vld [vmem:[#allocation4 + $0x170] sm:$0xff]  ;;  %v3310_v8 = vpack.c.bf16 %v384_v2, %v381_v1  ;;  %v69_v9 = vld [vmem:[%s3730_s0 + $0x30] sm:$0xff] }
  0x38   :  { %2469 = vmatprep.subr.bf16.mxu0 %v3259_v33  ;;  %2122 = vmatmul.mubr.msk.f32.vlgmr.msra.gmra.mrb[0].mxu1 %vm94_vm0, %v64_v21  ;;  %v404_v6 = vld [vmem:[#allocation4 + $0x158] sm:$0xff]  ;;  %v3317_v10 = vpack.c.bf16 %v400_v5, %v397_v4  ;;  %v387_v11 = vld [vmem:[#allocation4 + $0xd0] sm:$0xff]  ;;  %v390_v13 = vld [vmem:[#allocation4 + $0xe8] sm:$0xff] }
  0x39   :  { %2490 = vmatpush3.bf16.msra.mxu1 %v3262_v40  ;;  %2124 = vmatprep.mubr.msk.f32.mxu1 %vm94_vm0, %v65_v30  ;;  %v3320_v14 = vpack.c.bf16 %v407_v7, %v404_v6  ;;  %v403_v17 = vld [vmem:[#allocation4 + $0x150] sm:$0xff]  ;;  %v406_v18 = vld [vmem:[#allocation4 + $0x168] sm:$0xff]  ;;  %v3326_v19 = vpack.c.bf16 %v390_v13, %v387_v11  ;;  %v393_v24 = vld [vmem:[#allocation4 + $0x100] sm:$0xff] }
  0x3a   :  { %1921 = vmatmul.mubr.msk.f32.gmra.mrb[6].mxu0 %vm94_vm0, %v66_v41  ;;  %2491 = vmatprep.subr.bf16.mxu1 %v3137_v48  ;;  %v70_v20 = vld [vmem:[%s3730_s0 + $0x38] sm:$0xff]  ;;  %v3333_v21 = vpack.c.bf16 %v406_v18, %v403_v17  ;;  %v396_v25 = vld [vmem:[#allocation4 + $0x118] sm:$0xff]  ;;  %v399_v27 = vld [vmem:[#allocation4 + $0x130] sm:$0xff] }
  0x3b   :  { %2471 = vmatpush1.bf16.msra.mxu0 %v3269_v42  ;;  %207 = vmatprep.mubr.f32.mxu0 %v3136_v0  ;;  %v3340_v26 = vpack.c.bf16 %v396_v25, %v393_v24  ;;  %v402_v28 = vld [vmem:[#allocation4 + $0x148] sm:$0xff]  ;;  %v405_v30 = vld [vmem:[#allocation4 + $0x160] sm:$0xff]  ;;  %v408_v32 = vld [vmem:[#allocation4 + $0x178] sm:$0xff] }
  0x3c   :  { %2473 = vmatprep.subr.bf16.mxu0 %v3272_v45  ;;  %2125 = vmatmul.mubr.msk.f32.gmra.mrb[2].mxu1 %vm94_vm0, %v66_v41  ;;  %v3350_v29 = vpack.c.bf16 %v402_v28, %v399_v27  ;;  %v3359_v34 = vpack.c.bf16 %v408_v32, %v405_v30  ;;  %v77_v38 = vld [vmem:[%s3733_s3] sm:$0x7] }
  0x3d   :  { %2493 = vmatpush3.bf16.msra.mxu1 %v3278_v51  ;;  %2127 = vmatprep.mubr.msk.f32.mxu1 %vm94_vm0, %v67_v52  ;;  %v90_v39 = vrot.slane %v77_v38, %v89_v37  ;;  %v410_v60 = vld [vmem:[%s3735_s5] sm:$0x1]  ;;  %v3415_v1 = vrot.slane %v77_v38, %v85_v54 }
  0x3e   :  { %1922 = vmatmul.mubr.msk.f32.gmra.mrb[8].mxu0 %vm94_vm0, %v67_v52  ;;  %2494 = vmatprep.subr.bf16.mxu1 %v3137_v48  ;;  %v81_v52 = vsub.s32 0, %v80_v36  ;;  %v1934_v4 = vmul.f32 -1.442695, %v410_v60  ;;  %v3426_v37 = vld [vmem:[%s3734_s4] ss:$0 sm:$0xff] }
  0x3f   :  { %2475 = vmatpush1.bf16.msra.mxu0 %v3285_v53  ;;  %213 = vmatprep.mubr.f32.mxu0 %v3136_v0 }
  0x40   :  { %2477 = vmatprep.subr.bf16.mxu0 %v3288_v56  ;;  %2128 = vmatmul.mubr.msk.f32.gmra.mrb[4].mxu1 %vm94_vm0, %v68_v62  ;;  %v3408_v59 = vrot.slane %v77_v38, %v81_v52  ;;  %2970 = vpow2.f32 %v1934_v4 }
  0x41   :  { %2496 = vmatpush3.bf16.msra.mxu1 %v3294_v61  ;;  %2130 = vmatprep.mubr.msk.f32.mxu1 %vm94_vm0, %v69_v9 }
  0x42   :  { %1923 = vmatmul.mubr.msk.f32.gmra.mrb[10].mxu0 %vm94_vm0, %v68_v62  ;;  %2497 = vmatprep.subr.bf16.mxu1 %v3137_v48 }
  0x43   :  { %2479 = vmatpush1.bf16.msra.mxu0 %v3301_v63  ;;  %219 = vmatprep.mubr.f32.mxu0 %v3136_v0 }
  0x44   :  { %2481 = vmatprep.subr.bf16.mxu0 %v3304_v3  ;;  %2131 = vmatmul.mubr.msk.f32.gmra.mrb[6].mxu1 %vm94_vm0, %v70_v20 }
  0x45   :  { %2499 = vmatpush3.bf16.msra.mxu1 %v3310_v8  ;;  %2165 = vmatprep.mubr.msk.f32.mxu1 %vm3138_vm1, %v3136_v0 }
  0x46   :  { %1924 = vmatmul.mubr.msk.f32.gmra.mrb[12].mxu0 %vm94_vm0, %v69_v9  ;;  %2500 = vmatprep.subr.bf16.mxu1 %v3137_v48 }
  0x47   :  { %2483 = vmatpush1.bf16.msra.mxu0 %v3317_v10  ;;  %225 = vmatprep.mubr.f32.mxu0 %v3136_v0 }
  0x48   :  { %2485 = vmatprep.subr.bf16.mxu0 %v3320_v14 }
  0x49   :  { %2502 = vmatpush3.bf16.msra.mxu1 %v3326_v19 }
  0x4a   :  { %1925 = vmatmul.mubr.msk.f32.gmra.mrb[14].mxu0 %vm94_vm0, %v70_v20  ;;  %2503 = vmatprep.subr.bf16.mxu1 %v3137_v48  ;;  %v2971_v27 = vpop.eup %2970 }
  0x4b   :  { %2487 = vmatpush1.bf16.msra.mxu0 %v3333_v21  ;;  %482 = vmatprep.mubr.f32.mxu0 %v3136_v0  ;;  %v414_v32 = vadd.f32 1.0, %v2971_v27 }
  0x4c   :  { %2513 = vmatprep.subr.bf16.mxu0 %v3226_v12 }
  0x4d   :  { %2505 = vmatpush3.bf16.msra.mxu1 %v3340_v26 }
  0x4e   :  { %483 = vmatmul.mubr.f32.vlgmr.msra.gmra.mrb[0].mxu0 %v3136_v0  ;;  %2506 = vmatprep.subr.bf16.mxu1 %v3137_v48 }
  0x4f   :  { %2515 = vmatpush1.bf16.msra.mxu0 %v3228_v15  ;;  %664 = vmatprep.mubr.f32.mxu0 %v3136_v0 }
  0x50   :  { %2517 = vmatprep.subr.bf16.mxu0 %v3231_v16 }
  0x51   :  { %2508 = vmatpush3.bf16.msra.mxu1 %v3350_v29 }
  0x52   :  { %2509 = vmatprep.subr.bf16.mxu1 %v3137_v48 }
  0x53   :  { %2519 = vmatpush1.bf16.msra.mxu0 %v3239_v22 }
  0x54   :  { %2521 = vmatprep.subr.bf16.mxu0 %v3242_v23 }
  0x55   :  { %2511 = vmatpush3.bf16.msra.mxu1 %v3359_v34 }
  0x56   :  { %2544 = vmatprep.subr.bf16.mxu1 %v3137_v48 }
  0x57   :  { %2523 = vmatpush1.bf16.msra.mxu0 %v3256_v31 }
  0x58   :  { %2166 = vmatmul.mubr.f32.vlgmr.msra.gmra.mrb[8].mxu1 %v3136_v0  ;;  %2525 = vmatprep.subr.bf16.mxu0 %v3259_v33 }
  0x59   :  { %2546 = vmatpush3.bf16.msra.mxu1 %v3262_v40  ;;  %2200 = vmatprep.mubr.msk.f32.mxu1 %vm3138_vm1, %v3136_v0 }
  0x5a   :  { %2547 = vmatprep.subr.bf16.mxu1 %v3137_v48 }
  0x5b   :  { %2527 = vmatpush1.bf16.msra.mxu0 %v3269_v42 }
  0x5c   :  { %2529 = vmatprep.subr.bf16.mxu0 %v3272_v45 }
  0x5d   :  { %2549 = vmatpush3.bf16.msra.mxu1 %v3278_v51 }
  0x5e   :  { %2550 = vmatprep.subr.bf16.mxu1 %v3137_v48 }
  0x5f   :  { %2531 = vmatpush1.bf16.msra.mxu0 %v3285_v53 }
  0x60   :  { %2533 = vmatprep.subr.bf16.mxu0 %v3288_v56 }
  0x61   :  { %2552 = vmatpush3.bf16.msra.mxu1 %v3294_v61 }
  0x62   :  { %2553 = vmatprep.subr.bf16.mxu1 %v3137_v48 }
  0x63   :  { %2535 = vmatpush1.bf16.msra.mxu0 %v3301_v63 }
  0x64   :  { %2537 = vmatprep.subr.bf16.mxu0 %v3304_v3 }
  0x65   :  { %2555 = vmatpush3.bf16.msra.mxu1 %v3310_v8 }
  0x66   :  { %2556 = vmatprep.subr.bf16.mxu1 %v3137_v48 }
  0x67   :  { %2539 = vmatpush1.bf16.msra.mxu0 %v3317_v10 }
  0x68   :  { %2541 = vmatprep.subr.bf16.mxu0 %v3320_v14 }
  0x69   :  { %2558 = vmatpush3.bf16.msra.mxu1 %v3326_v19 }
  0x6a   :  { %2559 = vmatprep.subr.bf16.mxu1 %v3137_v48 }
  0x6b   :  { %2543 = vmatpush1.bf16.msra.mxu0 %v3333_v21 }
  0x6c   :  { %2569 = vmatprep.subr.bf16.mxu0 %v3226_v12 }
  0x6d   :  { %2561 = vmatpush3.bf16.msra.mxu1 %v3340_v26 }
  0x6e   :  { %2562 = vmatprep.subr.bf16.mxu1 %v3137_v48 }
  0x71   :  { %2564 = vmatpush3.bf16.msra.mxu1 %v3350_v29 }
  0x72   :  { %2565 = vmatprep.subr.bf16.mxu1 %v3137_v48 }
  0x75   :  { %2567 = vmatpush3.bf16.msra.mxu1 %v3359_v34 }
  0x76   :  { %2600 = vmatprep.subr.bf16.mxu1 %v3137_v48 }
 0x10b   :  { %v2123_v41 = vpop.f32.mrb[0].mxu1 }
 0x10c   :  { %v3400_v43 = vadd.f32 %v2123_v41, %v90_v39  ;;  %v298_v44 = vpop.f32.mrb[1].mxu1 }
 0x10f   :  { %v2126_v46 = vpop.f32.mrb[2].mxu1 }
 0x110   :  { %v3402_v47 = vadd.f32 %v2126_v46, %v90_v39  ;;  %v308_v49 = vpop.f32.mrb[3].mxu1  ;;  %v299_v46 = vadd.f32 %v298_v44, %v90_v39 }
 0x111   :  { %v3404_v50 = vadd.f32 %v308_v49, %v90_v39 }
 0x113   :  { %v2129_v55 = vpop.f32.mrb[4].mxu1 }
 0x114   :  { %v3406_v57 = vadd.f32 %v2129_v55, %v90_v39  ;;  %v318_v58 = vpop.f32.mrb[5].mxu1 }
 0x115   :  { %v3413_v62 = vadd.f32 %v318_v58, %v90_v39 }
 0x117   :  { %v2132_v2 = vpop.f32.mrb[6].mxu1 }
 0x118   :  { %v3417_v6 = vadd.f32 %v2132_v2, %v90_v39  ;;  %v328_v7 = vpop.f32.mrb[7].mxu1 }
 0x119   :  { %v3420_v13 = vadd.f32 %v328_v7, %v90_v39 }
 0x121   :  { %v484_v5 = vpop.f32.mrb[0].mxu0 }
 0x122   :  { %v2928_v9 = vadd.f32 %v484_v5, %v3408_v59  ;;  %v486_v11 = vpop.f32.mrb[1].mxu0 }
 0x123   :  { %v2929_v17 = vadd.f32 %v486_v11, %v3415_v1 }
 0x124   :  { %v1935_v18 = vmul.f32 -1.442695, %v2928_v9 }
 0x125   :  { %v1936_v20 = vmul.f32 -1.442695, %v2929_v17 }
 0x126   :  { %2972 = vpow2.f32 %v1935_v18 }
 0x127   :  { %2974 = vpow2.f32 %v1936_v20 }
 0x12b   :  { %v555_v24 = vpop.f32.mrb[8].mxu1 }
 0x12c   :  { %v2167_v25 = vpop.f32.mrb[9].mxu1  ;;  %v585_v38 = vadd.f32 %v3426_v37, %v555_v24 }
 0x130   :  { %v2973_v28 = vpop.eup %2972 }
 0x131   :  { %v569_v30 = vadd.f32 1.0, %v2973_v28  ;;  %v2975_v35 = vpop.eup %2974 }
 0x132   :  { %v576_v36 = vadd.f32 1.0, %v2975_v35 }
 0x133   :  { %2976 = vrcp.f32 %v569_v30 }
 0x134   :  { %2978 = vrcp.f32 %v414_v32 }
 0x135   :  { %2980 = vrcp.f32 %v576_v36 }
 0x13d   :  { %v2977_v41 = vpop.eup %2976 }
 0x13e   :  { %v586_v49 = vmul.f32 %v2977_v41, %v585_v38  ;;  %v2979_v54 = vpop.eup %2978 }
 0x13f   :  { %v3429_v58 = vrot.slane %v2979_v54, %v81_v52  ;;  %v2981_v60 = vpop.eup %2980 }
 0x140   :  { %v587_v55 = vadd.f32 %v586_v49, %v299_v46 }
 0x141   :  { %v595_v2 = vmul.f32 %v2981_v60, %v3429_v58 }
 0x142   :  { %2982 = vtanh.f32 %v587_v55 }
 0x143   :  { %v596_v4 = vsub.f32 1.0, %v595_v2  ;;  %v598_v9 = vmul.f32 0.0, %v595_v2 }
 0x14c   :  { %v2983_v5 = vpop.eup %2982 }
 0x14d   :  { %v597_v7 = vmul.f32 %v2983_v5, %v596_v4 }
 0x14f   :  { %v3432_v11 = vadd.f32 %v598_v9, %v597_v7 }
 0x151   :  { %665 = vmatmul.mubr.f32.vlgmr.msra.gmra.mrb[2].mxu0 %v3432_v11  ;;  %2201 = vmatmul.mubr.f32.vlgmr.msra.gmra.mrb[10].mxu1 %v3432_v11 }
 0x152   :  { %2571 = vmatpush1.bf16.msra.mxu0 %v3228_v15  ;;  %2602 = vmatpush3.bf16.msra.mxu1 %v3262_v40 }
 0x153   :  { %2573 = vmatprep.subr.bf16.mxu0 %v3231_v16  ;;  %2603 = vmatprep.subr.bf16.mxu1 %v3137_v48 }
 0x154   :  { %834 = vmatprep.mubr.f32.mxu0 %v3136_v0  ;;  %2235 = vmatprep.mubr.msk.f32.mxu1 %vm3138_vm1, %v3136_v0 }
 0x156   :  { %2575 = vmatpush1.bf16.msra.mxu0 %v3239_v22  ;;  %2605 = vmatpush3.bf16.msra.mxu1 %v3278_v51 }
 0x157   :  { %2577 = vmatprep.subr.bf16.mxu0 %v3242_v23  ;;  %2606 = vmatprep.subr.bf16.mxu1 %v3137_v48 }
 0x15a   :  { %2579 = vmatpush1.bf16.msra.mxu0 %v3256_v31  ;;  %2608 = vmatpush3.bf16.msra.mxu1 %v3294_v61 }
 0x15b   :  { %2581 = vmatprep.subr.bf16.mxu0 %v3259_v33  ;;  %2609 = vmatprep.subr.bf16.mxu1 %v3137_v48 }
 0x15e   :  { %2583 = vmatpush1.bf16.msra.mxu0 %v3269_v42  ;;  %2611 = vmatpush3.bf16.msra.mxu1 %v3310_v8 }
 0x15f   :  { %2585 = vmatprep.subr.bf16.mxu0 %v3272_v45  ;;  %2612 = vmatprep.subr.bf16.mxu1 %v3137_v48 }
 0x162   :  { %2587 = vmatpush1.bf16.msra.mxu0 %v3285_v53  ;;  %2614 = vmatpush3.bf16.msra.mxu1 %v3326_v19 }
 0x163   :  { %2589 = vmatprep.subr.bf16.mxu0 %v3288_v56  ;;  %2615 = vmatprep.subr.bf16.mxu1 %v3137_v48 }
 0x166   :  { %2591 = vmatpush1.bf16.msra.mxu0 %v3301_v63  ;;  %2617 = vmatpush3.bf16.msra.mxu1 %v3340_v26 }
 0x167   :  { %2593 = vmatprep.subr.bf16.mxu0 %v3304_v3  ;;  %2618 = vmatprep.subr.bf16.mxu1 %v3137_v48 }
 0x16a   :  { %2595 = vmatpush1.bf16.msra.mxu0 %v3317_v10  ;;  %2620 = vmatpush3.bf16.msra.mxu1 %v3350_v29 }
 0x16b   :  { %2597 = vmatprep.subr.bf16.mxu0 %v3320_v14  ;;  %2621 = vmatprep.subr.bf16.mxu1 %v3137_v48 }
 0x16e   :  { %2599 = vmatpush1.bf16.msra.mxu0 %v3333_v21  ;;  %2623 = vmatpush3.bf16.msra.mxu1 %v3359_v34 }
 0x16f   :  { %2625 = vmatprep.subr.bf16.mxu0 %v3226_v12  ;;  %2656 = vmatprep.subr.bf16.mxu1 %v3137_v48 }
 0x224   :  { %v666_v39 = vpop.f32.mrb[2].mxu0  ;;  %v737_v44 = vpop.f32.mrb[10].mxu1 }
 0x225   :  { %v2930_v52 = vadd.f32 %v666_v39, %v3408_v59  ;;  %v668_v17 = vpop.f32.mrb[3].mxu0  ;;  %v2202_v18 = vpop.f32.mrb[11].mxu1  ;;  %v761_v35 = vadd.f32 %v3426_v37, %v737_v44 }
 0x226   :  { %v2931_v20 = vadd.f32 %v668_v17, %v3415_v1 }
 0x227   :  { %v1938_v24 = vmul.f32 -1.442695, %v2930_v52 }
 0x228   :  { %v1939_v25 = vmul.f32 -1.442695, %v2931_v20 }
 0x229   :  { %2984 = vpow2.f32 %v1938_v24 }
 0x22a   :  { %2986 = vpow2.f32 %v1939_v25 }
 0x233   :  { %v2985_v27 = vpop.eup %2984 }
 0x234   :  { %v751_v28 = vadd.f32 1.0, %v2985_v27  ;;  %v2987_v30 = vpop.eup %2986 }
 0x235   :  { %v758_v32 = vadd.f32 1.0, %v2987_v30 }
 0x236   :  { %2988 = vrcp.f32 %v751_v28 }
 0x237   :  { %2990 = vrcp.f32 %v758_v32 }
 0x240   :  { %v2989_v36 = vpop.eup %2988 }
 0x241   :  { %v762_v38 = vmul.f32 %v2989_v36, %v761_v35  ;;  %v2991_v46 = vpop.eup %2990 }
 0x242   :  { %v765_v49 = vmul.f32 %v2991_v46, %v3429_v58 }
 0x243   :  { %v763_v41 = vadd.f32 %v762_v38, %v3400_v43 }
 0x244   :  { %v766_v54 = vsub.f32 1.0, %v765_v49  ;;  %v768_v2 = vmul.f32 %v765_v49, %v3432_v11 }
 0x245   :  { %2992 = vtanh.f32 %v763_v41 }
 0x24f   :  { %v2993_v55 = vpop.eup %2992 }
 0x250   :  { %v767_v60 = vmul.f32 %v2993_v55, %v766_v54 }
 0x252   :  { %v3477_v4 = vadd.f32 %v768_v2, %v767_v60 }
 0x254   :  { %835 = vmatmul.mubr.f32.vlgmr.msra.gmra.mrb[4].mxu0 %v3477_v4  ;;  %2236 = vmatmul.mubr.f32.vlgmr.msra.gmra.mrb[12].mxu1 %v3477_v4 }
 0x255   :  { %2627 = vmatpush1.bf16.msra.mxu0 %v3228_v15  ;;  %2658 = vmatpush3.bf16.msra.mxu1 %v3262_v40 }
 0x256   :  { %2629 = vmatprep.subr.bf16.mxu0 %v3231_v16  ;;  %2659 = vmatprep.subr.bf16.mxu1 %v3137_v48 }
 0x257   :  { %1004 = vmatprep.mubr.f32.mxu0 %v3136_v0  ;;  %2270 = vmatprep.mubr.msk.f32.mxu1 %vm3138_vm1, %v3136_v0 }
 0x259   :  { %2631 = vmatpush1.bf16.msra.mxu0 %v3239_v22  ;;  %2661 = vmatpush3.bf16.msra.mxu1 %v3278_v51 }
 0x25a   :  { %2633 = vmatprep.subr.bf16.mxu0 %v3242_v23  ;;  %2662 = vmatprep.subr.bf16.mxu1 %v3137_v48 }
 0x25d   :  { %2635 = vmatpush1.bf16.msra.mxu0 %v3256_v31  ;;  %2664 = vmatpush3.bf16.msra.mxu1 %v3294_v61 }
 0x25e   :  { %2637 = vmatprep.subr.bf16.mxu0 %v3259_v33  ;;  %2665 = vmatprep.subr.bf16.mxu1 %v3137_v48 }
 0x261   :  { %2639 = vmatpush1.bf16.msra.mxu0 %v3269_v42  ;;  %2667 = vmatpush3.bf16.msra.mxu1 %v3310_v8 }
 0x262   :  { %2641 = vmatprep.subr.bf16.mxu0 %v3272_v45  ;;  %2668 = vmatprep.subr.bf16.mxu1 %v3137_v48 }
 0x265   :  { %2643 = vmatpush1.bf16.msra.mxu0 %v3285_v53  ;;  %2670 = vmatpush3.bf16.msra.mxu1 %v3326_v19 }
 0x266   :  { %2645 = vmatprep.subr.bf16.mxu0 %v3288_v56  ;;  %2671 = vmatprep.subr.bf16.mxu1 %v3137_v48 }
 0x269   :  { %2647 = vmatpush1.bf16.msra.mxu0 %v3301_v63  ;;  %2673 = vmatpush3.bf16.msra.mxu1 %v3340_v26 }
 0x26a   :  { %2649 = vmatprep.subr.bf16.mxu0 %v3304_v3  ;;  %2674 = vmatprep.subr.bf16.mxu1 %v3137_v48 }
 0x26d   :  { %2651 = vmatpush1.bf16.msra.mxu0 %v3317_v10  ;;  %2676 = vmatpush3.bf16.msra.mxu1 %v3350_v29 }
 0x26e   :  { %2653 = vmatprep.subr.bf16.mxu0 %v3320_v14  ;;  %2677 = vmatprep.subr.bf16.mxu1 %v3137_v48 }
 0x271   :  { %2655 = vmatpush1.bf16.msra.mxu0 %v3333_v21  ;;  %2679 = vmatpush3.bf16.msra.mxu1 %v3359_v34 }
 0x272   :  { %2681 = vmatprep.subr.bf16.mxu0 %v3226_v12  ;;  %2712 = vmatprep.subr.bf16.mxu1 %v3137_v48 }
 0x327   :  { %v836_v43 = vpop.f32.mrb[4].mxu0  ;;  %v907_v5 = vpop.f32.mrb[12].mxu1 }
 0x328   :  { %v2932_v7 = vadd.f32 %v836_v43, %v3408_v59  ;;  %v838_v9 = vpop.f32.mrb[5].mxu0  ;;  %v2237_v11 = vpop.f32.mrb[13].mxu1  ;;  %v931_v25 = vadd.f32 %v3426_v37, %v907_v5 }
 0x329   :  { %v2933_v39 = vadd.f32 %v838_v9, %v3415_v1 }
 0x32a   :  { %v1940_v44 = vmul.f32 -1.442695, %v2932_v7 }
 0x32b   :  { %v1941_v52 = vmul.f32 -1.442695, %v2933_v39 }
 0x32c   :  { %2994 = vpow2.f32 %v1940_v44 }
 0x32d   :  { %2996 = vpow2.f32 %v1941_v52 }
 0x336   :  { %v2995_v17 = vpop.eup %2994 }
 0x337   :  { %v921_v18 = vadd.f32 1.0, %v2995_v17  ;;  %v2997_v20 = vpop.eup %2996 }
 0x338   :  { %v928_v24 = vadd.f32 1.0, %v2997_v20 }
 0x339   :  { %2998 = vrcp.f32 %v921_v18 }
 0x33a   :  { %3000 = vrcp.f32 %v928_v24 }
 0x343   :  { %v2999_v27 = vpop.eup %2998 }
 0x344   :  { %v932_v28 = vmul.f32 %v2999_v27, %v931_v25  ;;  %v3001_v32 = vpop.eup %3000 }
 0x345   :  { %v935_v35 = vmul.f32 %v3001_v32, %v3429_v58 }
 0x346   :  { %v933_v30 = vadd.f32 %v932_v28, %v3404_v50 }
 0x347   :  { %v936_v36 = vsub.f32 1.0, %v935_v35  ;;  %v938_v46 = vmul.f32 %v935_v35, %v3477_v4 }
 0x348   :  { %3002 = vtanh.f32 %v933_v30 }
 0x352   :  { %v3003_v38 = vpop.eup %3002 }
 0x353   :  { %v937_v41 = vmul.f32 %v3003_v38, %v936_v36 }
 0x355   :  { %v3522_v49 = vadd.f32 %v938_v46, %v937_v41 }
 0x357   :  { %1005 = vmatmul.mubr.f32.vlgmr.msra.gmra.mrb[6].mxu0 %v3522_v49  ;;  %2271 = vmatmul.mubr.f32.vlgmr.msra.gmra.mrb[14].mxu1 %v3522_v49 }
 0x358   :  { %2683 = vmatpush1.bf16.msra.mxu0 %v3228_v15  ;;  %2714 = vmatpush3.bf16.msra.mxu1 %v3262_v40 }
 0x359   :  { %2685 = vmatprep.subr.bf16.mxu0 %v3231_v16  ;;  %2715 = vmatprep.subr.bf16.mxu1 %v3137_v48 }
 0x35a   :  { %1174 = vmatprep.mubr.f32.mxu0 %v3136_v0  ;;  %2305 = vmatprep.mubr.msk.f32.mxu1 %vm3138_vm1, %v3136_v0 }
 0x35c   :  { %2687 = vmatpush1.bf16.msra.mxu0 %v3239_v22  ;;  %2717 = vmatpush3.bf16.msra.mxu1 %v3278_v51 }
 0x35d   :  { %2689 = vmatprep.subr.bf16.mxu0 %v3242_v23  ;;  %2718 = vmatprep.subr.bf16.mxu1 %v3137_v48 }
 0x360   :  { %2691 = vmatpush1.bf16.msra.mxu0 %v3256_v31  ;;  %2720 = vmatpush3.bf16.msra.mxu1 %v3294_v61 }
 0x361   :  { %2693 = vmatprep.subr.bf16.mxu0 %v3259_v33  ;;  %2721 = vmatprep.subr.bf16.mxu1 %v3137_v48 }
 0x364   :  { %2695 = vmatpush1.bf16.msra.mxu0 %v3269_v42  ;;  %2723 = vmatpush3.bf16.msra.mxu1 %v3310_v8 }
 0x365   :  { %2697 = vmatprep.subr.bf16.mxu0 %v3272_v45  ;;  %2724 = vmatprep.subr.bf16.mxu1 %v3137_v48 }
 0x368   :  { %2699 = vmatpush1.bf16.msra.mxu0 %v3285_v53  ;;  %2726 = vmatpush3.bf16.msra.mxu1 %v3326_v19 }
 0x369   :  { %2701 = vmatprep.subr.bf16.mxu0 %v3288_v56  ;;  %2727 = vmatprep.subr.bf16.mxu1 %v3137_v48 }
 0x36c   :  { %2703 = vmatpush1.bf16.msra.mxu0 %v3301_v63  ;;  %2729 = vmatpush3.bf16.msra.mxu1 %v3340_v26 }
 0x36d   :  { %2705 = vmatprep.subr.bf16.mxu0 %v3304_v3  ;;  %2730 = vmatprep.subr.bf16.mxu1 %v3137_v48 }
 0x370   :  { %2707 = vmatpush1.bf16.msra.mxu0 %v3317_v10  ;;  %2732 = vmatpush3.bf16.msra.mxu1 %v3350_v29 }
 0x371   :  { %2709 = vmatprep.subr.bf16.mxu0 %v3320_v14  ;;  %2733 = vmatprep.subr.bf16.mxu1 %v3137_v48 }
 0x374   :  { %2711 = vmatpush1.bf16.msra.mxu0 %v3333_v21  ;;  %2735 = vmatpush3.bf16.msra.mxu1 %v3359_v34 }
 0x375   :  { %2737 = vmatprep.subr.bf16.mxu0 %v3226_v12  ;;  %2768 = vmatprep.subr.bf16.mxu1 %v3137_v48 }
 0x42a   :  { %v1006_v50 = vpop.f32.mrb[6].mxu0  ;;  %v1077_v54 = vpop.f32.mrb[14].mxu1 }
 0x42b   :  { %v2934_v55 = vadd.f32 %v1006_v50, %v3408_v59  ;;  %v1008_v60 = vpop.f32.mrb[7].mxu0  ;;  %v2272_v2 = vpop.f32.mrb[15].mxu1  ;;  %v1101_v44 = vadd.f32 %v3426_v37, %v1077_v54 }
 0x42c   :  { %v2935_v4 = vadd.f32 %v1008_v60, %v3415_v1 }
 0x42d   :  { %v1942_v43 = vmul.f32 -1.442695, %v2934_v55 }
 0x42e   :  { %v1943_v5 = vmul.f32 -1.442695, %v2935_v4 }
 0x42f   :  { %3004 = vpow2.f32 %v1942_v43 }
 0x430   :  { %3006 = vpow2.f32 %v1943_v5 }
 0x439   :  { %v3005_v7 = vpop.eup %3004 }
 0x43a   :  { %v1091_v9 = vadd.f32 1.0, %v3005_v7  ;;  %v3007_v11 = vpop.eup %3006 }
 0x43b   :  { %v1098_v39 = vadd.f32 1.0, %v3007_v11 }
 0x43c   :  { %3008 = vrcp.f32 %v1091_v9 }
 0x43d   :  { %3010 = vrcp.f32 %v1098_v39 }
 0x446   :  { %v3009_v52 = vpop.eup %3008 }
 0x447   :  { %v1102_v17 = vmul.f32 %v3009_v52, %v1101_v44  ;;  %v3011_v20 = vpop.eup %3010 }
 0x448   :  { %v1105_v24 = vmul.f32 %v3011_v20, %v3429_v58 }
 0x449   :  { %v1103_v18 = vadd.f32 %v1102_v17, %v3402_v47 }
 0x44a   :  { %v1106_v25 = vsub.f32 1.0, %v1105_v24  ;;  %v1108_v30 = vmul.f32 %v1105_v24, %v3522_v49 }
 0x44b   :  { %3012 = vtanh.f32 %v1103_v18 }
 0x455   :  { %v3013_v27 = vpop.eup %3012 }
 0x456   :  { %v1107_v28 = vmul.f32 %v3013_v27, %v1106_v25 }
 0x458   :  { %v3567_v32 = vadd.f32 %v1108_v30, %v1107_v28 }
 0x45a   :  { %1175 = vmatmul.mubr.f32.vlgmr.msra.gmra.mrb[8].mxu0 %v3567_v32  ;;  %2306 = vmatmul.mubr.f32.vlgmr.msra.gmra.mrb[16].mxu1 %v3567_v32 }
 0x45b   :  { %2739 = vmatpush1.bf16.msra.mxu0 %v3228_v15  ;;  %2770 = vmatpush3.bf16.msra.mxu1 %v3262_v40 }
 0x45c   :  { %2741 = vmatprep.subr.bf16.mxu0 %v3231_v16  ;;  %2771 = vmatprep.subr.bf16.mxu1 %v3137_v48 }
 0x45d   :  { %1344 = vmatprep.mubr.f32.mxu0 %v3136_v0  ;;  %2340 = vmatprep.mubr.msk.f32.mxu1 %vm3138_vm1, %v3136_v0 }
 0x45f   :  { %2743 = vmatpush1.bf16.msra.mxu0 %v3239_v22  ;;  %2773 = vmatpush3.bf16.msra.mxu1 %v3278_v51 }
 0x460   :  { %2745 = vmatprep.subr.bf16.mxu0 %v3242_v23  ;;  %2774 = vmatprep.subr.bf16.mxu1 %v3137_v48 }
 0x463   :  { %2747 = vmatpush1.bf16.msra.mxu0 %v3256_v31  ;;  %2776 = vmatpush3.bf16.msra.mxu1 %v3294_v61 }
 0x464   :  { %2749 = vmatprep.subr.bf16.mxu0 %v3259_v33  ;;  %2777 = vmatprep.subr.bf16.mxu1 %v3137_v48 }
 0x467   :  { %2751 = vmatpush1.bf16.msra.mxu0 %v3269_v42  ;;  %2779 = vmatpush3.bf16.msra.mxu1 %v3310_v8 }
 0x468   :  { %2753 = vmatprep.subr.bf16.mxu0 %v3272_v45  ;;  %2780 = vmatprep.subr.bf16.mxu1 %v3137_v48 }
 0x46b   :  { %2755 = vmatpush1.bf16.msra.mxu0 %v3285_v53  ;;  %2782 = vmatpush3.bf16.msra.mxu1 %v3326_v19 }
 0x46c   :  { %2757 = vmatprep.subr.bf16.mxu0 %v3288_v56  ;;  %2783 = vmatprep.subr.bf16.mxu1 %v3137_v48 }
 0x46f   :  { %2759 = vmatpush1.bf16.msra.mxu0 %v3301_v63  ;;  %2785 = vmatpush3.bf16.msra.mxu1 %v3340_v26 }
 0x470   :  { %2761 = vmatprep.subr.bf16.mxu0 %v3304_v3  ;;  %2786 = vmatprep.subr.bf16.mxu1 %v3137_v48 }
 0x473   :  { %2763 = vmatpush1.bf16.msra.mxu0 %v3317_v10  ;;  %2788 = vmatpush3.bf16.msra.mxu1 %v3350_v29 }
 0x474   :  { %2765 = vmatprep.subr.bf16.mxu0 %v3320_v14  ;;  %2789 = vmatprep.subr.bf16.mxu1 %v3137_v48 }
 0x477   :  { %2767 = vmatpush1.bf16.msra.mxu0 %v3333_v21  ;;  %2791 = vmatpush3.bf16.msra.mxu1 %v3359_v34 }
 0x478   :  { %2793 = vmatprep.subr.bf16.mxu0 %v3226_v12  ;;  %2824 = vmatprep.subr.bf16.mxu1 %v3137_v48 }
 0x52d   :  { %v1176_v47 = vpop.f32.mrb[8].mxu0  ;;  %v1247_v35 = vpop.f32.mrb[16].mxu1 }
 0x52e   :  { %v2936_v36 = vadd.f32 %v1176_v47, %v3408_v59  ;;  %v1178_v38 = vpop.f32.mrb[9].mxu0  ;;  %v2307_v41 = vpop.f32.mrb[17].mxu1  ;;  %v1271_v4 = vadd.f32 %v3426_v37, %v1247_v35 }
 0x52f   :  { %v2937_v46 = vadd.f32 %v1178_v38, %v3415_v1 }
 0x530   :  { %v1944_v49 = vmul.f32 -1.442695, %v2936_v36 }
 0x531   :  { %v1945_v50 = vmul.f32 -1.442695, %v2937_v46 }
 0x532   :  { %3014 = vpow2.f32 %v1944_v49 }
 0x533   :  { %3016 = vpow2.f32 %v1945_v50 }
 0x53c   :  { %v3015_v54 = vpop.eup %3014 }
 0x53d   :  { %v1261_v55 = vadd.f32 1.0, %v3015_v54  ;;  %v3017_v60 = vpop.eup %3016 }
 0x53e   :  { %v1268_v2 = vadd.f32 1.0, %v3017_v60 }
 0x53f   :  { %3018 = vrcp.f32 %v1261_v55 }
 0x540   :  { %3020 = vrcp.f32 %v1268_v2 }
 0x549   :  { %v3019_v43 = vpop.eup %3018 }
 0x54a   :  { %v1272_v5 = vmul.f32 %v3019_v43, %v1271_v4  ;;  %v3021_v9 = vpop.eup %3020 }
 0x54b   :  { %v1275_v11 = vmul.f32 %v3021_v9, %v3429_v58  ;;  %v1798_v9 = vld [vmem:[#allocation7 + $0x18] sm:$0xff] }
 0x54c   :  { %v1273_v7 = vadd.f32 %v1272_v5, %v3413_v62  ;;  %v1796_v5 = vld [vmem:[#allocation7 + $0x8] sm:$0xff] }
 0x54d   :  { %v1276_v39 = vsub.f32 1.0, %v1275_v11  ;;  %v1278_v17 = vmul.f32 %v1275_v11, %v3567_v32 }
 0x54e   :  { %3022 = vtanh.f32 %v1273_v7  ;;  %v1797_v7 = vld [vmem:[#allocation7 + $0x10] sm:$0xff] }
 0x54f   :  { %v2908_v11 = vpack.c.bf16 %v1798_v9, %v1797_v7 }
 0x558   :  { %v3023_v44 = vpop.eup %3022 }
 0x559   :  { %v1277_v52 = vmul.f32 %v3023_v44, %v1276_v39  ;;  %v1799_v39 = vld [vmem:[#allocation7 + $0x20] sm:$0xff]  ;;  %v1800_v44 = vld [vmem:[#allocation7 + $0x28] sm:$0xff] }
 0x55b   :  { %v3612_v18 = vadd.f32 %v1278_v17, %v1277_v52  ;;  %v2911_v52 = vpack.c.bf16 %v1800_v44, %v1799_v39  ;;  %v1801_v17 = vld [vmem:[#allocation7 + $0x30] sm:$0xff] }
 0x55d   :  { %1345 = vmatmul.mubr.f32.vlgmr.msra.gmra.mrb[10].mxu0 %v3612_v18  ;;  %2341 = vmatmul.mubr.f32.vlgmr.msra.gmra.mrb[18].mxu1 %v3612_v18 }
 0x55e   :  { %2795 = vmatpush1.bf16.msra.mxu0 %v3228_v15  ;;  %2826 = vmatpush3.bf16.msra.mxu1 %v3262_v40 }
 0x55f   :  { %2797 = vmatprep.subr.bf16.mxu0 %v3231_v16  ;;  %2827 = vmatprep.subr.bf16.mxu1 %v3137_v48 }
 0x560   :  { %1514 = vmatprep.mubr.f32.mxu0 %v3136_v0  ;;  %2375 = vmatprep.mubr.msk.f32.mxu1 %vm3138_vm1, %v3136_v0 }
 0x562   :  { %2799 = vmatpush1.bf16.msra.mxu0 %v3239_v22  ;;  %2829 = vmatpush3.bf16.msra.mxu1 %v3278_v51 }
 0x563   :  { %2801 = vmatprep.subr.bf16.mxu0 %v3242_v23  ;;  %2830 = vmatprep.subr.bf16.mxu1 %v3137_v48 }
 0x566   :  { %2803 = vmatpush1.bf16.msra.mxu0 %v3256_v31  ;;  %2832 = vmatpush3.bf16.msra.mxu1 %v3294_v61 }
 0x567   :  { %2805 = vmatprep.subr.bf16.mxu0 %v3259_v33  ;;  %2833 = vmatprep.subr.bf16.mxu1 %v3137_v48 }
 0x56a   :  { %2807 = vmatpush1.bf16.msra.mxu0 %v3269_v42  ;;  %2835 = vmatpush3.bf16.msra.mxu1 %v3310_v8 }
 0x56b   :  { %2809 = vmatprep.subr.bf16.mxu0 %v3272_v45  ;;  %2836 = vmatprep.subr.bf16.mxu1 %v3137_v48 }
 0x56e   :  { %2811 = vmatpush1.bf16.msra.mxu0 %v3285_v53  ;;  %2838 = vmatpush3.bf16.msra.mxu1 %v3326_v19 }
 0x56f   :  { %2813 = vmatprep.subr.bf16.mxu0 %v3288_v56  ;;  %2839 = vmatprep.subr.bf16.mxu1 %v3137_v48 }
 0x572   :  { %2815 = vmatpush1.bf16.msra.mxu0 %v3301_v63  ;;  %2841 = vmatpush3.bf16.msra.mxu1 %v3340_v26 }
 0x573   :  { %2817 = vmatprep.subr.bf16.mxu0 %v3304_v3  ;;  %2842 = vmatprep.subr.bf16.mxu1 %v3137_v48 }
 0x576   :  { %2819 = vmatpush1.bf16.msra.mxu0 %v3317_v10  ;;  %2844 = vmatpush3.bf16.msra.mxu1 %v3350_v29 }
 0x577   :  { %2821 = vmatprep.subr.bf16.mxu0 %v3320_v14  ;;  %2845 = vmatprep.subr.bf16.mxu1 %v3137_v48 }
 0x57a   :  { %2823 = vmatpush1.bf16.msra.mxu0 %v3333_v21  ;;  %2847 = vmatpush3.bf16.msra.mxu1 %v3359_v34 }
 0x57b   :  { %2849 = vmatprep.subr.bf16.mxu0 %v3226_v12  ;;  %2880 = vmatprep.subr.bf16.mxu1 %v3137_v48 }
 0x630   :  { %v1346_v62 = vpop.f32.mrb[10].mxu0  ;;  %v1417_v20 = vpop.f32.mrb[18].mxu1 }
 0x631   :  { %v2938_v24 = vadd.f32 %v1346_v62, %v3408_v59  ;;  %v1348_v25 = vpop.f32.mrb[11].mxu0  ;;  %v2342_v27 = vpop.f32.mrb[19].mxu1  ;;  %v1441_v12 = vadd.f32 %v3426_v37, %v1417_v20  ;;  %v1803_v62 = vld [vmem:[#allocation7 + $0x40] sm:$0xff]  ;;  %v1804_v20 = vld [vmem:[#allocation7 + $0x48] sm:$0xff] }
 0x632   :  { %v2939_v28 = vadd.f32 %v1348_v25, %v3415_v1  ;;  %v1805_v25 = vld [vmem:[#allocation7 + $0x50] sm:$0xff]  ;;  %v1806_v27 = vld [vmem:[#allocation7 + $0x58] sm:$0xff] }
 0x633   :  { %v1946_v30 = vmul.f32 -1.442695, %v2938_v24  ;;  %v2917_v24 = vpack.c.bf16 %v1804_v20, %v1803_v62 }
 0x634   :  { %v1947_v32 = vmul.f32 -1.442695, %v2939_v28  ;;  %v2920_v28 = vpack.c.bf16 %v1806_v27, %v1805_v25 }
 0x635   :  { %3024 = vpow2.f32 %v1946_v30  ;;  %v1807_v30 = vld [vmem:[#allocation7 + $0x60] sm:$0xff] }
 0x636   :  { %3026 = vpow2.f32 %v1947_v32  ;;  %v1808_v32 = vld [vmem:[#allocation7 + $0x68] sm:$0xff] }
 0x63f   :  { %v3025_v47 = vpop.eup %3024 }
 0x640   :  { %v1431_v35 = vadd.f32 1.0, %v3025_v47  ;;  %v3027_v36 = vpop.eup %3026  ;;  %v2923_v47 = vpack.c.bf16 %v1808_v32, %v1807_v30 }
 0x641   :  { %v1438_v38 = vadd.f32 1.0, %v3027_v36  ;;  %v1810_v36 = vld [vmem:[#allocation7 + $0x78] sm:$0xff] }
 0x642   :  { %3028 = vrcp.f32 %v1431_v35  ;;  %v1809_v35 = vld [vmem:[#allocation7 + $0x70] sm:$0xff] }
 0x643   :  { %3030 = vrcp.f32 %v1438_v38  ;;  %v2926_v38 = vpack.c.bf16 %v1810_v36, %v1809_v35 }
 0x64c   :  { %v3029_v41 = vpop.eup %3028 }
 0x64d   :  { %v1442_v46 = vmul.f32 %v3029_v41, %v1441_v12  ;;  %v3031_v50 = vpop.eup %3030 }
 0x64e   :  { %v1445_v54 = vmul.f32 %v3031_v50, %v3429_v58 }
 0x64f   :  { %v1443_v49 = vadd.f32 %v1442_v46, %v3406_v57  ;;  %v1795_v57 = vld [vmem:[#allocation7] sm:$0xff] }
 0x650   :  { %v1446_v55 = vsub.f32 1.0, %v1445_v54  ;;  %v1448_v4 = vmul.f32 %v1445_v54, %v3612_v18 }
 0x651   :  { %3032 = vtanh.f32 %v1443_v49 }
 0x65b   :  { %v3033_v60 = vpop.eup %3032 }
 0x65c   :  { %v1447_v2 = vmul.f32 %v3033_v60, %v1446_v55 }
 0x65e   :  { %v1449_v43 = vadd.f32 %v1448_v4, %v1447_v2 }
 0x660   :  { %1515 = vmatmul.mubr.f32.vlgmr.msra.gmra.mrb[12].mxu0 %v1449_v43  ;;  %2376 = vmatmul.mubr.f32.vlgmr.msra.gmra.mrb[20].mxu1 %v1449_v43 }
 0x661   :  { %2851 = vmatpush1.bf16.msra.mxu0 %v3228_v15  ;;  %2882 = vmatpush3.bf16.msra.mxu1 %v3262_v40 }
 0x662   :  { %2853 = vmatprep.subr.bf16.mxu0 %v3231_v16  ;;  %2883 = vmatprep.subr.bf16.mxu1 %v3137_v48 }
 0x663   :  { %1684 = vmatprep.mubr.f32.mxu0 %v3136_v0  ;;  %2410 = vmatprep.mubr.msk.f32.mxu1 %vm3138_vm1, %v3136_v0 }
 0x665   :  { %2855 = vmatpush1.bf16.msra.mxu0 %v3239_v22  ;;  %2885 = vmatpush3.bf16.msra.mxu1 %v3278_v51 }
 0x666   :  { %2857 = vmatprep.subr.bf16.mxu0 %v3242_v23  ;;  %2886 = vmatprep.subr.bf16.mxu1 %v3137_v48 }
 0x669   :  { %2859 = vmatpush1.bf16.msra.mxu0 %v3256_v31  ;;  %2888 = vmatpush3.bf16.msra.mxu1 %v3294_v61 }
 0x66a   :  { %2861 = vmatprep.subr.bf16.mxu0 %v3259_v33  ;;  %2889 = vmatprep.subr.bf16.mxu1 %v3137_v48 }
 0x66d   :  { %2863 = vmatpush1.bf16.msra.mxu0 %v3269_v42  ;;  %2891 = vmatpush3.bf16.msra.mxu1 %v3310_v8 }
 0x66e   :  { %2865 = vmatprep.subr.bf16.mxu0 %v3272_v45  ;;  %2892 = vmatprep.subr.bf16.mxu1 %v3137_v48 }
 0x671   :  { %2867 = vmatpush1.bf16.msra.mxu0 %v3285_v53  ;;  %2894 = vmatpush3.bf16.msra.mxu1 %v3326_v19 }
 0x672   :  { %2869 = vmatprep.subr.bf16.mxu0 %v3288_v56  ;;  %2895 = vmatprep.subr.bf16.mxu1 %v3137_v48 }
 0x675   :  { %2871 = vmatpush1.bf16.msra.mxu0 %v3301_v63  ;;  %2897 = vmatpush3.bf16.msra.mxu1 %v3340_v26 }
 0x676   :  { %2873 = vmatprep.subr.bf16.mxu0 %v3304_v3  ;;  %2898 = vmatprep.subr.bf16.mxu1 %v3137_v48 }
 0x679   :  { %2875 = vmatpush1.bf16.msra.mxu0 %v3317_v10  ;;  %2900 = vmatpush3.bf16.msra.mxu1 %v3350_v29 }
 0x67a   :  { %2877 = vmatprep.subr.bf16.mxu0 %v3320_v14  ;;  %2901 = vmatprep.subr.bf16.mxu1 %v3137_v48 }
 0x67d   :  { %2879 = vmatpush1.bf16.msra.mxu0 %v3333_v21  ;;  %2903 = vmatpush3.bf16.msra.mxu1 %v3359_v34 }
 0x67e   :  { %2904 = vmatprep.subr.bf16.mxu0 %v3137_v48 }
 0x733   :  { %v1516_v15 = vpop.f32.mrb[12].mxu0  ;;  %v1587_v16 = vpop.f32.mrb[20].mxu1 }
 0x734   :  { %v2940_v22 = vadd.f32 %v1516_v15, %v3408_v59  ;;  %v1518_v23 = vpop.f32.mrb[13].mxu0  ;;  %v2377_v31 = vpop.f32.mrb[21].mxu1  ;;  %v1611_v61 = vadd.f32 %v3426_v37, %v1587_v16 }
 0x735   :  { %v2941_v33 = vadd.f32 %v1518_v23, %v3415_v1 }
 0x736   :  { %v1948_v40 = vmul.f32 -1.442695, %v2940_v22 }
 0x737   :  { %v1949_v42 = vmul.f32 -1.442695, %v2941_v33 }
 0x738   :  { %3034 = vpow2.f32 %v1948_v40 }
 0x739   :  { %3036 = vpow2.f32 %v1949_v42 }
 0x742   :  { %v3035_v45 = vpop.eup %3034 }
 0x743   :  { %v1601_v51 = vadd.f32 1.0, %v3035_v45  ;;  %v3037_v53 = vpop.eup %3036 }
 0x744   :  { %v1608_v56 = vadd.f32 1.0, %v3037_v53 }
 0x745   :  { %3038 = vrcp.f32 %v1601_v51  ;;  %v1952_v51 = vld [vmem:[%s3737_s7] ss:$0 sm:$0xff] }
 0x746   :  { %3040 = vrcp.f32 %v1608_v56 }
 0x74f   :  { %v3039_v63 = vpop.eup %3038 }
 0x750   :  { %v1612_v3 = vmul.f32 %v3039_v63, %v1611_v61  ;;  %v3041_v10 = vpop.eup %3040 }
 0x751   :  { %v1615_v14 = vmul.f32 %v3041_v10, %v3429_v58 }
 0x752   :  { %v1613_v8 = vadd.f32 %v1612_v3, %v3420_v13  ;;  %v2905_v13 = vpack.c.bf16 %v1796_v5, %v1795_v57 }
 0x753   :  { %v1616_v19 = vsub.f32 1.0, %v1615_v14  ;;  %v1618_v29 = vmul.f32 %v1615_v14, %v1449_v43 }
 0x754   :  { %3042 = vtanh.f32 %v1613_v8 }
 0x75e   :  { %v3043_v21 = vpop.eup %3042 }
 0x75f   :  { %v1617_v26 = vmul.f32 %v3043_v21, %v1616_v19 }
 0x761   :  { %v3696_v34 = vadd.f32 %v1618_v29, %v1617_v26 }
 0x763   :  { %1685 = vmatmul.mubr.f32.vlgmr.msra.gmra.mrb[14].mxu0 %v3696_v34  ;;  %2411 = vmatmul.mubr.f32.vlgmr.msra.gmra.mrb[22].mxu1 %v3696_v34 }
 0x764   :  { %2445 = vmatprep.mubr.msk.f32.mxu0 %vm3138_vm1, %v3136_v0  ;;  %2906 = vmatpush3.bf16.msra.mxu0 %v2905_v13  ;;  %v1802_v0 = vld [vmem:[#allocation7 + $0x38] sm:$0xff] }
 0x765   :  { %2907 = vmatprep.subr.bf16.mxu0 %v3137_v48  ;;  %v2914_v18 = vpack.c.bf16 %v1802_v0, %v1801_v17 }
 0x768   :  { %2909 = vmatpush3.bf16.msra.mxu0 %v2908_v11 }
 0x769   :  { %2910 = vmatprep.subr.bf16.mxu0 %v3137_v48 }
 0x76c   :  { %2912 = vmatpush3.bf16.msra.mxu0 %v2911_v52 }
 0x76d   :  { %2913 = vmatprep.subr.bf16.mxu0 %v3137_v48 }
 0x770   :  { %2915 = vmatpush3.bf16.msra.mxu0 %v2914_v18 }
 0x771   :  { %2916 = vmatprep.subr.bf16.mxu0 %v3137_v48 }
 0x774   :  { %2918 = vmatpush3.bf16.msra.mxu0 %v2917_v24 }
 0x775   :  { %2919 = vmatprep.subr.bf16.mxu0 %v3137_v48 }
 0x778   :  { %2921 = vmatpush3.bf16.msra.mxu0 %v2920_v28 }
 0x779   :  { %2922 = vmatprep.subr.bf16.mxu0 %v3137_v48 }
 0x77c   :  { %2924 = vmatpush3.bf16.msra.mxu0 %v2923_v47 }
 0x77d   :  { %2925 = vmatprep.subr.bf16.mxu0 %v3137_v48 }
 0x780   :  { %2927 = vmatpush3.bf16.msra.mxu0 %v2926_v38 }
 0x836   :  { %v1686_v12 = vpop.f32.mrb[14].mxu0  ;;  %v1757_v41 = vpop.f32.mrb[22].mxu1 }
 0x837   :  { %v2942_v46 = vadd.f32 %v1686_v12, %v3408_v59  ;;  %v1688_v49 = vpop.f32.mrb[15].mxu0  ;;  %v2412_v50 = vpop.f32.mrb[23].mxu1  ;;  %v1781_v48 = vadd.f32 %v3426_v37, %v1757_v41 }
 0x838   :  { %v2943_v54 = vadd.f32 %v1688_v49, %v3415_v1 }
 0x839   :  { %v1950_v55 = vmul.f32 -1.442695, %v2942_v46 }
 0x83a   :  { %v1951_v60 = vmul.f32 -1.442695, %v2943_v54 }
 0x83b   :  { %3044 = vpow2.f32 %v1950_v55 }
 0x83c   :  { %3046 = vpow2.f32 %v1951_v60 }
 0x845   :  { %v3045_v2 = vpop.eup %3044 }
 0x846   :  { %v1771_v4 = vadd.f32 1.0, %v3045_v2  ;;  %v3047_v43 = vpop.eup %3046 }
 0x847   :  { %v1778_v15 = vadd.f32 1.0, %v3047_v43 }
 0x848   :  { %3048 = vrcp.f32 %v1771_v4 }
 0x849   :  { %3050 = vrcp.f32 %v1778_v15 }
 0x852   :  { %v3049_v16 = vpop.eup %3048 }
 0x853   :  { %v1782_v22 = vmul.f32 %v3049_v16, %v1781_v48  ;;  %v3051_v23 = vpop.eup %3050 }
 0x854   :  { %v1785_v1 = vmul.f32 %v3051_v23, %v3429_v58 }
 0x855   :  { %v1783_v59 = vadd.f32 %v1782_v22, %v3417_v6 }
 0x856   :  { %v1786_v31 = vsub.f32 1.0, %v1785_v1  ;;  %v1788_v42 = vmul.f32 %v1785_v1, %v3696_v34 }
 0x857   :  { %3052 = vtanh.f32 %v1783_v59 }
 0x861   :  { %v3053_v33 = vpop.eup %3052 }
 0x862   :  { %v1787_v40 = vmul.f32 %v3053_v33, %v1786_v31 }
 0x864   :  { %v1789_v45 = vadd.f32 %v1788_v42, %v1787_v40 }
 0x866   :  { %2446 = vmatmul.mubr.f32.vlgmr.msra.gmra.mrb[16].mxu0 %v1789_v45 }
 0x939   :  { %v1884_v37 = vpop.f32.mrb[16].mxu0 }
 0x93a   :  { %v1885_v53 = vadd.f32 %v1952_v51, %v1884_v37  ;;  %v2447_v56 = vpop.f32.mrb[17].mxu0 }
 0x93c   :  { %v1953_v61 = vmul.f32 -1.442695, %v1885_v53 }
 0x93e   :  { %3054 = vpow2.f32 %v1953_v61 }
 0x948   :  { %v3055_v6 = vpop.eup %3054 }
 0x949   :  { %v1891_v63 = vadd.f32 1.0, %v3055_v6 }
 0x94b   :  { %3056 = vrcp.f32 %v1891_v63 }
 0x955   :  { %v3057_v58 = vpop.eup %3056 }
 0x956   :  { %1894 = vst [vmem:[#allocation9] sm:$0xff] %v3057_v58 }
 0x957   :  { %3113 = shalt.err (!%p3110_p6)
}
 0x958   :  { %s3114_s20 = scalar_lea.hbm %s3738_s8, 128 }
 0x959   :  { %p3115_p7 = scmp.ne.s32.totalorder %s3738_s8, %s3114_s20  ;;  %p3118_p8 = scmp.lt.u32.totalorder %s3114_s20, %s3738_s8 }
 0x95b   :  { %p3120_p9 = pnand %p3118_p8, %p3115_p7 }
 0x95d   :  { %3123 = shalt.err (!%p3120_p9)
}
 0x95e   :  { %1904 = dma.vmem_to_hbm [thread:$0]  %s1902_s17, 128, %s3738_s8, [#allocation6]  }
 0x95f   :  { %3128 = dma.done.wait [#allocation6], 128  }
 0x960   :  { %3129 = vsyncadd [#allocation6], 4294967168 }
 0x961   :  { %1908 = vsyncpa [#allocation5], 1 }
 0x962   :  { %1909 = vsyncpa [#allocation8], 1 }
 0x963   :  { %1910 = vsyncpa [#allocation6], 1 }

</bundles_post_ra>
